<compile_context>
chip_gen: v6e
topology: v6e:2x2x1
jax: 0.10.0
libtpu: 0.0.40
codegen_flags: <defaults>
</compile_context>

<pallas_src>
import functools

import jax
import jax.numpy as jnp
from jax import lax
from jax.experimental import pallas as pl
from jax.experimental.pallas import tpu as pltpu

LN_EPS = 1e-5          # torch.nn.LayerNorm default
NEG_INF = -1e30


def _layernorm(v, g, b):
    mu = jnp.mean(v, axis=-1, keepdims=True)
    var = jnp.mean((v - mu) ** 2, axis=-1, keepdims=True)
    return (v - mu) * lax.rsqrt(var + LN_EPS) * g + b


def _agg_kernel(heads, m_valid, mask_needed,
                lat_ref, ctxT_ref,
                ln1_g, ln1_b,
                wqk_ref, wvo_ref, bo_ref,
                pn1_g, pn1_b,
                ln2_g, ln2_b,
                w1_ref, b1_ref, w2_ref, b2_ref,
                pn2_g, pn2_b,
                out_ref,
                x_sc, qk_sc, m_sc, l_sc, uT_sc):
    l_idx = pl.program_id(1)
    m_idx = pl.program_id(2)
    num_l = pl.num_programs(1)
    num_m = pl.num_programs(2)

    N = x_sc.shape[0]
    MT = ctxT_ref.shape[2]

    # ---- new batch element: load the (broadcast) latent queries into the resident state ----
    @pl.when(jnp.logical_and(l_idx == 0, m_idx == 0))
    def _init_x():
        x_sc[...] = lat_ref[...]

    # ---- new layer: PreNorm(x), composite q@Wk^T projection (scale & ctx-LN gamma folded),
    #      reset the fused-head online-softmax state ----
    @pl.when(m_idx == 0)
    def _init_layer():
        xn = _layernorm(x_sc[...], ln1_g[0], ln1_b[0]).astype(jnp.bfloat16)
        for h in range(heads):                      # static unroll; rows h*N:(h+1)*N = head h
            qk_h = jnp.dot(xn, wqk_ref[0, h], preferred_element_type=jnp.float32)   # (N, C)
            qk_sc[h * N:(h + 1) * N, :] = qk_h.astype(jnp.bfloat16)
        m_sc[...] = jnp.full_like(m_sc, NEG_INF)
        l_sc[...] = jnp.zeros_like(l_sc)
        uT_sc[...] = jnp.zeros_like(uT_sc)

    # ---- hot loop: one lane-dense (C, MT) context tile, all heads fused as rows ----
    ctxT = ctxT_ref[0]                                                    # (C, MT) bf16
    sim = jnp.dot(qk_sc[...], ctxT, preferred_element_type=jnp.float32)   # (heads*N, MT) f32
    if mask_needed:
        # Only the LAST tile can contain padded columns and it always holds >=1 valid
        # column (n_m = ceil(M/MT)), so a fully-masked tile (which would corrupt the
        # online softmax) cannot occur.
        col = m_idx * MT + lax.broadcasted_iota(jnp.int32, (1, MT), 1)
        sim = jnp.where(col < m_valid, sim, NEG_INF)

    m_prev = m_sc[...]                                                    # (heads*N, 1)
    m_new = jnp.maximum(m_prev, jnp.max(sim, axis=-1, keepdims=True))
    alpha = jnp.exp(m_prev - m_new)
    p = jnp.exp(sim - m_new)                                              # (heads*N, MT) f32
    l_sc[...] = alpha * l_sc[...] + jnp.sum(p, axis=-1, keepdims=True)
    pT = p.T.astype(jnp.bfloat16)                                         # (MT, heads*N), tiny XLU transpose
    uT_sc[...] = uT_sc[...] * alpha.T + jnp.dot(ctxT, pT,
                                                preferred_element_type=jnp.float32)
    m_sc[...] = m_new

    # ---- last context tile: finish attention (Wv@Wo folded into wvo), residual, PostNorm,
    #      GEGLU FF, residual, PostNorm; update the resident latent state ----
    @pl.when(m_idx == num_m - 1)
    def _finish_layer():
        inv_l = 1.0 / l_sc[...]                                           # exact; once per layer
        u = (uT_sc[...].T * inv_l).astype(jnp.bfloat16)                   # (heads*N, C)
        attn = bo_ref[0] + jnp.dot(u[0:N, :], wvo_ref[0, 0],
                                   preferred_element_type=jnp.float32)    # (N, D)
        for h in range(1, heads):
            attn = attn + jnp.dot(u[h * N:(h + 1) * N, :], wvo_ref[0, h],
                                  preferred_element_type=jnp.float32)

        x = attn + x_sc[...]                                              # residual
        x = _layernorm(x, pn1_g[0], pn1_b[0])                             # PostNorm 1

        xn2 = _layernorm(x, ln2_g[0], ln2_b[0])                           # PreNorm (FF)
        h1 = jnp.dot(xn2.astype(jnp.bfloat16), w1_ref[0],
                     preferred_element_type=jnp.float32) + b1_ref[0]      # (N, 2*mult*D)
        hid = h1.shape[1] // 2
        # TODO(synk): PyTorch F.gelu is exact (erf-based); tanh-approx GELU used for robust TPU lowering.
        act = h1[:, :hid] * jax.nn.gelu(h1[:, hid:], approximate=True)
        ff = jnp.dot(act.astype(jnp.bfloat16), w2_ref[0],
                     preferred_element_type=jnp.float32) + b2_ref[0]      # (N, D)

        x = ff + x                                                        # residual
        x_sc[...] = _layernorm(x, pn2_g[0], pn2_b[0])                     # PostNorm 2

    @pl.when(jnp.logical_and(m_idx == num_m - 1, l_idx == num_l - 1))
    def _write_out():
        out_ref[0] = x_sc[...]


def _vmem_limit_bytes():
    # ~75% of physical VMEM: ~48 MiB on v7x (64 MiB/TC), ~96 MiB on v5e/v6e (128 MiB).
    try:
        return int(pltpu.get_tpu_info().vmem_capacity_bytes) * 3 // 4
    except Exception:
        return 48 << 20


def aggregation_block_forward(data, params, heads, *, m_tile=None):
    """forward(): flatten spatial axes, broadcast latents, run all layers in one pallas_call."""
    B = data.shape[0]
    C = data.shape[-1]
    data = data.reshape(B, -1, C).astype(jnp.float32)      # 'b ... d -> b (...) d'
    M = data.shape[1]

    latents = params['latents'].astype(jnp.float32)        # (N, D)
    N, D = latents.shape
    layers = params['layers']
    L = len(layers)
    inner = layers[0]['wq'].shape[1]
    assert inner % heads == 0
    dh = inner // heads
    scale = dh ** -0.5

    # Context LayerNorm is layer-independent up to its affine params: normalize once here.
    # gamma folds into wqk/wvo, beta folds into bo (the matching k-bias cancels under softmax).
    mu = data.mean(-1, keepdims=True)
    var = ((data - mu) ** 2).mean(-1, keepdims=True)
    cn0 = (data - mu) / jnp.sqrt(var + LN_EPS)

    # Context tile width (lane dimension).
    if m_tile is None:
        # Keep the whole context resident when one (C, M_pad) bf16 tile (double-buffered)
        # fits a modest VMEM slice: the ctx block index is then constant across the depth
        # axis and Pallas elides re-DMAing the context for every layer.  Otherwise stream
        # 1024-wide tiles (fits v7x's 64 MiB VMEM after the FLOP/temporary reductions).
        full = -(-M // 128) * 128
        MT = full if (2 * full * C * 2) <= (16 << 20) else 1024
    else:
        MT = int(m_tile)
    assert MT % 128 == 0, "m_tile must be a multiple of 128"
    n_m = -(-M // MT)
    M_pad = n_m * MT
    if M_pad != M:
        cn0 = jnp.pad(cn0, ((0, 0), (0, M_pad - M), (0, 0)))

    # Pad channels to a sublane multiple (zero channels contribute nothing anywhere).
    C_p = -(-C // 8) * 8
    if C_p != C:
        cn0 = jnp.pad(cn0, ((0, 0), (0, 0), (0, C_p - C)))
    # Single lane-dense context operand: (B, C_p, M_pad), tokens in the lane dimension.
    ctxT_b = jnp.swapaxes(cn0, 1, 2).astype(jnp.bfloat16)

    bf = jnp.bfloat16
    hi = lax.Precision.HIGHEST

    def st(fn, dtype=jnp.float32):
        return jnp.stack([fn(lp) for lp in layers]).astype(dtype)

    def wqk_one(lp):
        wk = lp['lnc_g'].reshape(C, 1) * lp['wkv'][:, :inner]       # ctx-LN gamma folded
        wq_h = lp['wq'].reshape(D, heads, dh)
        wk_h = wk.reshape(C, heads, dh)
        w = scale * jnp.einsum('dhe,che->hdc', wq_h, wk_h, precision=hi)   # (heads, D, C)
        return jnp.pad(w, ((0, 0), (0, 0), (0, C_p - C)))

    def wvo_one(lp):
        wv = lp['lnc_g'].reshape(C, 1) * lp['wkv'][:, inner:]       # ctx-LN gamma folded
        wv_h = wv.reshape(C, heads, dh)
        wo_h = lp['wo'].reshape(heads, dh, D)
        w = jnp.einsum('che,hed->hcd', wv_h, wo_h, precision=hi)           # (heads, C, D)
        return jnp.pad(w, ((0, 0), (0, C_p - C), (0, 0)))

    ln1_g = st(lambda lp: lp['ln1_g']); ln1_b = st(lambda lp: lp['ln1_b'])
    wqk = st(wqk_one, bf)                                            # (L, heads, D, C_p)
    wvo = st(wvo_one, bf)                                            # (L, heads, C_p, D)
    bo = st(lambda lp: lp['bo']
            + (lp['lnc_b'].reshape(1, C) @ lp['wkv'][:, inner:]) @ lp['wo'])   # (L, 1, D)
    pn1_g = st(lambda lp: lp['pn1_g']); pn1_b = st(lambda lp: lp['pn1_b'])
    ln2_g = st(lambda lp: lp['ln2_g']); ln2_b = st(lambda lp: lp['ln2_b'])
    w1 = st(lambda lp: lp['w1'], bf); b1 = st(lambda lp: lp['b1'])
    w2 = st(lambda lp: lp['w2'], bf); b2 = st(lambda lp: lp['b2'])
    pn2_g = st(lambda lp: lp['pn2_g']); pn2_b = st(lambda lp: lp['pn2_b'])

    def per_layer(arr):      # full-weight block indexed by the depth grid axis
        nd = arr.ndim
        return pl.BlockSpec((1,) + arr.shape[1:],
                            lambda b, l, m, _n=nd: (l,) + (0,) * (_n - 1))

    in_specs = [
        pl.BlockSpec((N, D), lambda b, l, m: (0, 0)),                # latents (shared)
        # TODO(synk): on v5e consider pipeline_mode=pl.Buffered(3) here once fully memory-bound.
        pl.BlockSpec((1, C_p, MT), lambda b, l, m: (b, 0, m)),       # normalized ctx^T tile
        per_layer(ln1_g), per_layer(ln1_b),
        per_layer(wqk), per_layer(wvo), per_layer(bo),
        per_layer(pn1_g), per_layer(pn1_b),
        per_layer(ln2_g), per_layer(ln2_b),
        per_layer(w1), per_layer(b1), per_layer(w2), per_layer(b2),
        per_layer(pn2_g), per_layer(pn2_b),
    ]

    kernel = functools.partial(_agg_kernel, heads, M, M_pad != M)

    return pl.pallas_call(
        kernel,
        out_shape=jax.ShapeDtypeStruct((B, N, D), jnp.float32),
        grid_spec=pltpu.PrefetchScalarGridSpec(
            num_scalar_prefetch=0,
            grid=(B, L, n_m),
            in_specs=in_specs,
            out_specs=pl.BlockSpec((1, N, D), lambda b, l, m: (b, 0, 0)),
            scratch_shapes=[
                pltpu.VMEM((N, D), jnp.float32),                # resident latent state x
                pltpu.VMEM((heads * N, C_p), jnp.bfloat16),     # fused per-head q@Wk^T
                pltpu.VMEM((heads * N, 1), jnp.float32),        # online-softmax running max
                pltpu.VMEM((heads * N, 1), jnp.float32),        # online-softmax running denom
                pltpu.VMEM((C_p, heads * N), jnp.float32),      # U^T numerator accumulator
            ],
        ),
        compiler_params=pltpu.CompilerParams(
            # TODO(synk): only the batch axis is megacore-parallel; on v7x with B==1 one
            # TensorCore idles (would need an M-axis core split with a flash-style combine).
            dimension_semantics=("parallel", "arbitrary", "arbitrary"),
            vmem_limit_bytes=_vmem_limit_bytes(),
        ),
    )(latents, ctxT_b,
      ln1_g, ln1_b, wqk, wvo, bo,
      pn1_g, pn1_b, ln2_g, ln2_b, w1, b1, w2, b2, pn2_g, pn2_b)


# --------------------------- deterministic parameter init ---------------------------
def init_params(key, *, depth, input_channels, num_latents, latent_dim, heads, dim_head, ff_mult):
    inner = heads * dim_head
    D, C = latent_dim, input_channels
    keys = jax.random.split(key, depth + 1)
    params = {'latents': jax.random.normal(keys[0], (num_latents, D), jnp.float32)}

    def lin(kk, fan_in, fan_out):
        return jax.random.normal(kk, (fan_in, fan_out), jnp.float32) / jnp.sqrt(float(fan_in))

    def ln_aff(kk, dim):
        # Non-trivial LayerNorm affine params (as after training) so the kernel's
        # LN-folding algebra is actually exercised by the correctness check.
        k1, k2 = jax.random.split(kk)
        return (1.0 + 0.1 * jax.random.normal(k1, (1, dim), jnp.float32),
                0.1 * jax.random.normal(k2, (1, dim), jnp.float32))

    layers = []
    for i in range(depth):
        k = jax.random.split(keys[i + 1], 13)
        ln1_g, ln1_b = ln_aff(k[5], D)
        lnc_g, lnc_b = ln_aff(k[6], C)
        pn1_g, pn1_b = ln_aff(k[7], D)
        ln2_g, ln2_b = ln_aff(k[8], D)
        pn2_g, pn2_b = ln_aff(k[9], D)
        layers.append({
            'ln1_g': ln1_g, 'ln1_b': ln1_b,             # PreNorm (query)
            'lnc_g': lnc_g, 'lnc_b': lnc_b,             # PreNorm (context)
            'wq': lin(k[0], D, inner),                  # to_q (no bias)
            'wkv': lin(k[1], C, 2 * inner),             # to_kv (no bias)
            'wo': lin(k[2], inner, D),
            'bo': 0.1 * jax.random.normal(k[10], (1, D), jnp.float32),
            'pn1_g': pn1_g, 'pn1_b': pn1_b,             # PostNorm 1
            'ln2_g': ln2_g, 'ln2_b': ln2_b,             # PreNorm (ff)
            'w1': lin(k[3], D, 2 * ff_mult * D),
            'b1': 0.1 * jax.random.normal(k[11], (1, 2 * ff_mult * D), jnp.float32),
            'w2': lin(k[4], ff_mult * D, D),
            'b2': 0.1 * jax.random.normal(k[12], (1, D), jnp.float32),
            'pn2_g': pn2_g, 'pn2_b': pn2_b,             # PostNorm 2
        })
    params['layers'] = layers
    return params


# --------------------------- pure-JAX reference (unfolded math, f32) ---------------------------
def reference_forward(data, params, heads):
    B = data.shape[0]
    data = data.reshape(B, -1, data.shape[-1]).astype(jnp.float32)
    N, D = params['latents'].shape
    x = jnp.broadcast_to(params['latents'][None], (B, N, D)).astype(jnp.float32)

    def ln(v, g, b):
        mu = v.mean(-1, keepdims=True)
        var = ((v - mu) ** 2).mean(-1, keepdims=True)
        return (v - mu) / jnp.sqrt(var + LN_EPS) * g + b

    hi = jax.lax.Precision.HIGHEST
    for lp in params['layers']:
        xn = ln(x, lp['ln1_g'], lp['ln1_b'])
        cn = ln(data, lp['lnc_g'], lp['lnc_b'])
        q = jnp.einsum('bnd,de->bne', xn, lp['wq'], precision=hi)
        kv = jnp.einsum('bmc,ce->bme', cn, lp['wkv'], precision=hi)
        inner = lp['wq'].shape[1]
        k, v = kv[..., :inner], kv[..., inner:]
        dh = inner // heads
        qh = q.reshape(B, N, heads, dh)
        kh = k.reshape(B, -1, heads, dh)
        vh = v.reshape(B, -1, heads, dh)
        sim = jnp.einsum('bnhd,bmhd->bhnm', qh, kh, precision=hi) * dh ** -0.5
        attn = jax.nn.softmax(sim, axis=-1)
        o = jnp.einsum('bhnm,bmhd->bnhd', attn, vh, precision=hi).reshape(B, N, inner)
        o = jnp.einsum('bne,ed->bnd', o, lp['wo'], precision=hi) + lp['bo']
        x = ln(o + x, lp['pn1_g'], lp['pn1_b'])
        xn2 = ln(x, lp['ln2_g'], lp['ln2_b'])
        h1 = jnp.einsum('bnd,de->bne', xn2, lp['w1'], precision=hi) + lp['b1']
        hid = lp['w1'].shape[1] // 2
        act = h1[..., :hid] * jax.nn.gelu(h1[..., hid:], approximate=True)
        ff = jnp.einsum('bne,ed->bnd', act, lp['w2'], precision=hi) + lp['b2']
        x = ln(ff + x, lp['pn2_g'], lp['pn2_b'])
    return x


if __name__ == "__main__":
    # Small, forward-consistent shapes (latent_dim must equal num_classes).
    depth = 2
    input_channels = 4      # C
    num_latents = 8         # N
    latent_dim = 32         # D == num_classes
    heads = 4               # hardcoded in the PyTorch module's Attention
    dim_head = 512          # hardcoded in the PyTorch module's Attention
    ff_mult = 4
    B, H, W = 2, 16, 16     # data: (B, H, W, C) channels-last

    key = jax.random.PRNGKey(0)
    kp, kd = jax.random.split(key)
    params = init_params(kp, depth=depth, input_channels=input_channels,
                         num_latents=num_latents, latent_dim=latent_dim,
                         heads=heads, dim_head=dim_head, ff_mult=ff_mult)
    data = jax.random.normal(kd, (B, H, W, input_channels), jnp.float32)

    # m_tile=128 -> M=256 gives 2 context tiles: exercises the online-softmax accumulation.
    out = aggregation_block_forward(data, params, heads, m_tile=128)
    out = jax.block_until_ready(out)
    ref = reference_forward(data, params, heads)
    assert out.shape == (B, num_latents, latent_dim)
    assert bool(jnp.isfinite(out).all())
    max_err = float(jnp.max(jnp.abs(out - ref)))
    assert max_err < 5e-2, f"max abs err vs reference: {max_err}"

    # Ragged context (M=100 < tile), auto tile selection: exercises the padded-column mask path.
    data2 = jax.random.normal(jax.random.PRNGKey(1), (B, 10, 10, input_channels), jnp.float32)
    out2 = jax.block_until_ready(aggregation_block_forward(data2, params, heads))
    ref2 = reference_forward(data2, params, heads)
    assert bool(jnp.isfinite(out2).all())
    max_err2 = float(jnp.max(jnp.abs(out2 - ref2)))
    assert max_err2 < 5e-2, f"max abs err (masked) vs reference: {max_err2}"

    print("KERNEL_OK")
</pallas_src>

<mosaic_0001>
module attributes {stable_mosaic.version = 11 : i64} {
  func.func @_agg_kernel(%arg0: i32, %arg1: i32, %arg2: i32, %arg3: memref<8x32xf32, #tpu.memory_space<vmem>>, %arg4: memref<1x8x128xbf16, #tpu.memory_space<vmem>>, %arg5: memref<1x1x32xf32, #tpu.memory_space<vmem>>, %arg6: memref<1x1x32xf32, #tpu.memory_space<vmem>>, %arg7: memref<1x4x32x8xbf16, #tpu.memory_space<vmem>>, %arg8: memref<1x4x8x32xbf16, #tpu.memory_space<vmem>>, %arg9: memref<1x1x32xf32, #tpu.memory_space<vmem>>, %arg10: memref<1x1x32xf32, #tpu.memory_space<vmem>>, %arg11: memref<1x1x32xf32, #tpu.memory_space<vmem>>, %arg12: memref<1x1x32xf32, #tpu.memory_space<vmem>>, %arg13: memref<1x1x32xf32, #tpu.memory_space<vmem>>, %arg14: memref<1x32x256xbf16, #tpu.memory_space<vmem>>, %arg15: memref<1x1x256xf32, #tpu.memory_space<vmem>>, %arg16: memref<1x128x32xbf16, #tpu.memory_space<vmem>>, %arg17: memref<1x1x32xf32, #tpu.memory_space<vmem>>, %arg18: memref<1x1x32xf32, #tpu.memory_space<vmem>>, %arg19: memref<1x1x32xf32, #tpu.memory_space<vmem>>, %arg20: memref<1x8x32xf32, #tpu.memory_space<vmem>>, %arg21: memref<8x32xf32, #tpu.memory_space<vmem>>, %arg22: memref<32x8xbf16, #tpu.memory_space<vmem>>, %arg23: memref<32x1xf32, #tpu.memory_space<vmem>>, %arg24: memref<32x1xf32, #tpu.memory_space<vmem>>, %arg25: memref<8x32xf32, #tpu.memory_space<vmem>>) attributes {dimension_semantics = [#tpu.dimension_semantics<parallel>, #tpu.dimension_semantics<arbitrary>, #tpu.dimension_semantics<arbitrary>], iteration_bounds = array<i64: 2, 2, 2>, scalar_prefetch = 0 : i64, scratch_operands = 5 : i64, tpu.core_type = #tpu.core_type<tc>, window_params = [{pipeline_mode = #tpu.pipeline_mode<synchronous>, transform_indices = @transform_0, window_bounds = array<i64: 8, 32>}, {transform_indices = @transform_1, window_bounds = array<i64: 1, 8, 128>}, {transform_indices = @transform_2, window_bounds = array<i64: 1, 1, 32>}, {transform_indices = @transform_3, window_bounds = array<i64: 1, 1, 32>}, {transform_indices = @transform_4, window_bounds = array<i64: 1, 4, 32, 8>}, {transform_indices = @transform_5, window_bounds = array<i64: 1, 4, 8, 32>}, {transform_indices = @transform_6, window_bounds = array<i64: 1, 1, 32>}, {transform_indices = @transform_7, window_bounds = array<i64: 1, 1, 32>}, {transform_indices = @transform_8, window_bounds = array<i64: 1, 1, 32>}, {transform_indices = @transform_9, window_bounds = array<i64: 1, 1, 32>}, {transform_indices = @transform_10, window_bounds = array<i64: 1, 1, 32>}, {transform_indices = @transform_11, window_bounds = array<i64: 1, 32, 256>}, {transform_indices = @transform_12, window_bounds = array<i64: 1, 1, 256>}, {transform_indices = @transform_13, window_bounds = array<i64: 1, 128, 32>}, {transform_indices = @transform_14, window_bounds = array<i64: 1, 1, 32>}, {transform_indices = @transform_15, window_bounds = array<i64: 1, 1, 32>}, {transform_indices = @transform_16, window_bounds = array<i64: 1, 1, 32>}, {transform_indices = @transform_17, window_bounds = array<i64: 1, 8, 32>}]} {
    %c0_i32 = arith.constant 0 : i32
    %0 = arith.cmpi eq, %arg1, %c0_i32 : i32
    %c0_i32_0 = arith.constant 0 : i32
    %1 = arith.cmpi eq, %arg2, %c0_i32_0 : i32
    %2 = arith.andi %0, %1 : i1
    %3 = arith.extui %2 : i1 to i32
    %c0_i32_1 = arith.constant 0 : i32
    %4 = arith.cmpi ne, %3, %c0_i32_1 : i32
    scf.if %4 {
      %c0_27 = arith.constant 0 : index
      %c0_28 = arith.constant 0 : index
      %45 = vector.load %arg3[%c0_27, %c0_28] : memref<8x32xf32, #tpu.memory_space<vmem>>, vector<8x32xf32>
      %c0_29 = arith.constant 0 : index
      %c0_30 = arith.constant 0 : index
      %46 = vector.load %arg21[%c0_29, %c0_30] : memref<8x32xf32, #tpu.memory_space<vmem>>, vector<8x32xf32>
      tpu.vector_store %arg21[%c0_29, %c0_30], %45 {strides = array<i32>} : memref<8x32xf32, #tpu.memory_space<vmem>>, vector<8x32xf32>,
    } else {
    }
    %c0_i32_2 = arith.constant 0 : i32
    %5 = arith.cmpi eq, %arg2, %c0_i32_2 : i32
    %6 = arith.extui %5 : i1 to i32
    %c0_i32_3 = arith.constant 0 : i32
    %7 = arith.cmpi ne, %6, %c0_i32_3 : i32
    scf.if %7 {
      %c0_27 = arith.constant 0 : index
      %c0_28 = arith.constant 0 : index
      %45 = vector.load %arg21[%c0_27, %c0_28] : memref<8x32xf32, #tpu.memory_space<vmem>>, vector<8x32xf32>
      %c0_29 = arith.constant 0 : index
      %c0_30 = arith.constant 0 : index
      %c0_31 = arith.constant 0 : index
      %46 = vector.load %arg5[%c0_29, %c0_30, %c0_31] : memref<1x1x32xf32, #tpu.memory_space<vmem>>, vector<1x1x32xf32>
      %47 = vector.shape_cast %46 : vector<1x1x32xf32> to vector<1x32xf32>
      %c0_32 = arith.constant 0 : index
      %c0_33 = arith.constant 0 : index
      %c0_34 = arith.constant 0 : index
      %48 = vector.load %arg6[%c0_32, %c0_33, %c0_34] : memref<1x1x32xf32, #tpu.memory_space<vmem>>, vector<1x1x32xf32>
      %49 = vector.shape_cast %48 : vector<1x1x32xf32> to vector<1x32xf32>
      %cst_35 = arith.constant dense<0.000000e+00> : vector<8xf32>
      %50 = vector.multi_reduction <add>, %45, %cst_35 [1] : vector<8x32xf32> to vector<8xf32>
      %51 = vector.shape_cast %50 : vector<8xf32> to vector<8x1xf32>
      %cst_36 = arith.constant 3.200000e+01 : f32
      %52 = vector.broadcast %cst_36 : f32 to vector<8x1xf32>
      %53 = arith.divf %51, %52 : vector<8x1xf32>
      %54 = vector.broadcast %53 : vector<8x1xf32> to vector<8x32xf32>
      %55 = arith.subf %45, %54 : vector<8x32xf32>
      %56 = arith.mulf %55, %55 : vector<8x32xf32>
      %cst_37 = arith.constant dense<0.000000e+00> : vector<8xf32>
      %57 = vector.multi_reduction <add>, %56, %cst_37 [1] : vector<8x32xf32> to vector<8xf32>
      %58 = vector.shape_cast %57 : vector<8xf32> to vector<8x1xf32>
      %cst_38 = arith.constant 3.200000e+01 : f32
      %59 = vector.broadcast %cst_38 : f32 to vector<8x1xf32>
      %60 = arith.divf %58, %59 : vector<8x1xf32>
      %61 = vector.broadcast %53 : vector<8x1xf32> to vector<8x32xf32>
      %62 = arith.subf %45, %61 : vector<8x32xf32>
      %cst_39 = arith.constant 9.99999974E-6 : f32
      %63 = vector.broadcast %cst_39 : f32 to vector<8x1xf32>
      %64 = arith.addf %60, %63 : vector<8x1xf32>
      %65 = math.rsqrt %64 : vector<8x1xf32>
      %66 = vector.broadcast %65 : vector<8x1xf32> to vector<8x32xf32>
      %67 = arith.mulf %62, %66 : vector<8x32xf32>
      %68 = vector.broadcast %47 : vector<1x32xf32> to vector<8x32xf32>
      %69 = arith.mulf %67, %68 : vector<8x32xf32>
      %70 = vector.broadcast %49 : vector<1x32xf32> to vector<8x32xf32>
      %71 = arith.addf %69, %70 : vector<8x32xf32>
      %72 = arith.truncf %71 : vector<8x32xf32> to vector<8x32xbf16>
      %c0_40 = arith.constant 0 : index
      %c0_41 = arith.constant 0 : index
      %c0_42 = arith.constant 0 : index
      %c0_43 = arith.constant 0 : index
      %73 = vector.load %arg7[%c0_40, %c0_41, %c0_42, %c0_43] : memref<1x4x32x8xbf16, #tpu.memory_space<vmem>>, vector<1x1x32x8xbf16>
      %74 = vector.shape_cast %73 : vector<1x1x32x8xbf16> to vector<32x8xbf16>
      %cst_44 = arith.constant dense<0.000000e+00> : vector<8x8xf32>
      %75 = tpu.matmul %72, %74, %cst_44 {dimension_numbers = #tpu.dot_dimension_numbers<[1], [0], [0], [1], [0, 0, 1, 1], [], []>} : vector<8x32xbf16>, vector<32x8xbf16>, vector<8x8xf32> -> vector<8x8xf32>
      %76 = arith.truncf %75 : vector<8x8xf32> to vector<8x8xbf16>
      %c0_45 = arith.constant 0 : index
      %c0_46 = arith.constant 0 : index
      %77 = vector.load %arg22[%c0_45, %c0_46] : memref<32x8xbf16, #tpu.memory_space<vmem>>, vector<8x8xbf16>
      tpu.vector_store %arg22[%c0_45, %c0_46], %76 {strides = array<i32>} : memref<32x8xbf16, #tpu.memory_space<vmem>>, vector<8x8xbf16>,
      %c0_47 = arith.constant 0 : index
      %c1 = arith.constant 1 : index
      %c0_48 = arith.constant 0 : index
      %c0_49 = arith.constant 0 : index
      %78 = vector.load %arg7[%c0_47, %c1, %c0_48, %c0_49] : memref<1x4x32x8xbf16, #tpu.memory_space<vmem>>, vector<1x1x32x8xbf16>
      %79 = vector.shape_cast %78 : vector<1x1x32x8xbf16> to vector<32x8xbf16>
      %cst_50 = arith.constant dense<0.000000e+00> : vector<8x8xf32>
      %80 = tpu.matmul %72, %79, %cst_50 {dimension_numbers = #tpu.dot_dimension_numbers<[1], [0], [0], [1], [0, 0, 1, 1], [], []>} : vector<8x32xbf16>, vector<32x8xbf16>, vector<8x8xf32> -> vector<8x8xf32>
      %81 = arith.truncf %80 : vector<8x8xf32> to vector<8x8xbf16>
      %c8 = arith.constant 8 : index
      %c0_51 = arith.constant 0 : index
      %82 = vector.load %arg22[%c8, %c0_51] : memref<32x8xbf16, #tpu.memory_space<vmem>>, vector<8x8xbf16>
      tpu.vector_store %arg22[%c8, %c0_51], %81 {strides = array<i32>} : memref<32x8xbf16, #tpu.memory_space<vmem>>, vector<8x8xbf16>,
      %c0_52 = arith.constant 0 : index
      %c2 = arith.constant 2 : index
      %c0_53 = arith.constant 0 : index
      %c0_54 = arith.constant 0 : index
      %83 = vector.load %arg7[%c0_52, %c2, %c0_53, %c0_54] : memref<1x4x32x8xbf16, #tpu.memory_space<vmem>>, vector<1x1x32x8xbf16>
      %84 = vector.shape_cast %83 : vector<1x1x32x8xbf16> to vector<32x8xbf16>
      %cst_55 = arith.constant dense<0.000000e+00> : vector<8x8xf32>
      %85 = tpu.matmul %72, %84, %cst_55 {dimension_numbers = #tpu.dot_dimension_numbers<[1], [0], [0], [1], [0, 0, 1, 1], [], []>} : vector<8x32xbf16>, vector<32x8xbf16>, vector<8x8xf32> -> vector<8x8xf32>
      %86 = arith.truncf %85 : vector<8x8xf32> to vector<8x8xbf16>
      %c16 = arith.constant 16 : index
      %c0_56 = arith.constant 0 : index
      %87 = vector.load %arg22[%c16, %c0_56] : memref<32x8xbf16, #tpu.memory_space<vmem>>, vector<8x8xbf16>
      tpu.vector_store %arg22[%c16, %c0_56], %86 {strides = array<i32>} : memref<32x8xbf16, #tpu.memory_space<vmem>>, vector<8x8xbf16>,
      %c0_57 = arith.constant 0 : index
      %c3 = arith.constant 3 : index
      %c0_58 = arith.constant 0 : index
      %c0_59 = arith.constant 0 : index
      %88 = vector.load %arg7[%c0_57, %c3, %c0_58, %c0_59] : memref<1x4x32x8xbf16, #tpu.memory_space<vmem>>, vector<1x1x32x8xbf16>
      %89 = vector.shape_cast %88 : vector<1x1x32x8xbf16> to vector<32x8xbf16>
      %cst_60 = arith.constant dense<0.000000e+00> : vector<8x8xf32>
      %90 = tpu.matmul %72, %89, %cst_60 {dimension_numbers = #tpu.dot_dimension_numbers<[1], [0], [0], [1], [0, 0, 1, 1], [], []>} : vector<8x32xbf16>, vector<32x8xbf16>, vector<8x8xf32> -> vector<8x8xf32>
      %91 = arith.truncf %90 : vector<8x8xf32> to vector<8x8xbf16>
      %c24 = arith.constant 24 : index
      %c0_61 = arith.constant 0 : index
      %92 = vector.load %arg22[%c24, %c0_61] : memref<32x8xbf16, #tpu.memory_space<vmem>>, vector<8x8xbf16>
      tpu.vector_store %arg22[%c24, %c0_61], %91 {strides = array<i32>} : memref<32x8xbf16, #tpu.memory_space<vmem>>, vector<8x8xbf16>,
      %cst_62 = arith.constant -1.000000e+30 : f32
      %93 = vector.broadcast %cst_62 : f32 to vector<32x1xf32>
      %c0_63 = arith.constant 0 : index
      %c0_64 = arith.constant 0 : index
      %94 = vector.load %arg23[%c0_63, %c0_64] : memref<32x1xf32, #tpu.memory_space<vmem>>, vector<32x1xf32>
      tpu.vector_store %arg23[%c0_63, %c0_64], %93 {strides = array<i32>} : memref<32x1xf32, #tpu.memory_space<vmem>>, vector<32x1xf32>,
      %cst_65 = arith.constant 0.000000e+00 : f32
      %95 = vector.broadcast %cst_65 : f32 to vector<32x1xf32>
      %c0_66 = arith.constant 0 : index
      %c0_67 = arith.constant 0 : index
      %96 = vector.load %arg24[%c0_66, %c0_67] : memref<32x1xf32, #tpu.memory_space<vmem>>, vector<32x1xf32>
      tpu.vector_store %arg24[%c0_66, %c0_67], %95 {strides = array<i32>} : memref<32x1xf32, #tpu.memory_space<vmem>>, vector<32x1xf32>,
      %cst_68 = arith.constant 0.000000e+00 : f32
      %97 = vector.broadcast %cst_68 : f32 to vector<8x32xf32>
      %c0_69 = arith.constant 0 : index
      %c0_70 = arith.constant 0 : index
      %98 = vector.load %arg25[%c0_69, %c0_70] : memref<8x32xf32, #tpu.memory_space<vmem>>, vector<8x32xf32>
      tpu.vector_store %arg25[%c0_69, %c0_70], %97 {strides = array<i32>} : memref<8x32xf32, #tpu.memory_space<vmem>>, vector<8x32xf32>,
    } else {
    }
    %c0 = arith.constant 0 : index
    %c0_4 = arith.constant 0 : index
    %c0_5 = arith.constant 0 : index
    %8 = vector.load %arg4[%c0, %c0_4, %c0_5] : memref<1x8x128xbf16, #tpu.memory_space<vmem>>, vector<1x8x128xbf16>
    %9 = vector.shape_cast %8 : vector<1x8x128xbf16> to vector<8x128xbf16>
    %c0_6 = arith.constant 0 : index
    %c0_7 = arith.constant 0 : index
    %10 = vector.load %arg22[%c0_6, %c0_7] : memref<32x8xbf16, #tpu.memory_space<vmem>>, vector<32x8xbf16>
    %cst = arith.constant dense<0.000000e+00> : vector<32x128xf32>
    %11 = tpu.matmul %10, %9, %cst {dimension_numbers = #tpu.dot_dimension_numbers<[1], [0], [0], [1], [0, 0, 1, 1], [], []>} : vector<32x8xbf16>, vector<8x128xbf16>, vector<32x128xf32> -> vector<32x128xf32>
    %c0_8 = arith.constant 0 : index
    %c0_9 = arith.constant 0 : index
    %12 = vector.load %arg23[%c0_8, %c0_9] : memref<32x1xf32, #tpu.memory_space<vmem>>, vector<32x1xf32>
    %cst_10 = arith.constant dense<0xFF800000> : vector<32xf32>
    %13 = vector.multi_reduction <maximumf>, %11, %cst_10 [1] : vector<32x128xf32> to vector<32xf32>
    %14 = vector.shape_cast %13 : vector<32xf32> to vector<32x1xf32>
    %15 = arith.maximumf %12, %14 : vector<32x1xf32>
    %16 = arith.subf %12, %15 : vector<32x1xf32>
    %17 = math.exp %16 : vector<32x1xf32>
    %18 = vector.broadcast %15 : vector<32x1xf32> to vector<32x128xf32>
    %19 = arith.subf %11, %18 : vector<32x128xf32>
    %20 = math.exp %19 : vector<32x128xf32>
    %c0_11 = arith.constant 0 : index
    %c0_12 = arith.constant 0 : index
    %21 = vector.load %arg24[%c0_11, %c0_12] : memref<32x1xf32, #tpu.memory_space<vmem>>, vector<32x1xf32>
    %22 = arith.mulf %17, %21 : vector<32x1xf32>
    %cst_13 = arith.constant dense<0.000000e+00> : vector<32xf32>
    %23 = vector.multi_reduction <add>, %20, %cst_13 [1] : vector<32x128xf32> to vector<32xf32>
    %24 = vector.shape_cast %23 : vector<32xf32> to vector<32x1xf32>
    %25 = arith.addf %22, %24 : vector<32x1xf32>
    %c0_14 = arith.constant 0 : index
    %c0_15 = arith.constant 0 : index
    %26 = vector.load %arg24[%c0_14, %c0_15] : memref<32x1xf32, #tpu.memory_space<vmem>>, vector<32x1xf32>
    tpu.vector_store %arg24[%c0_14, %c0_15], %25 {strides = array<i32>} : memref<32x1xf32, #tpu.memory_space<vmem>>, vector<32x1xf32>,
    %27 = tpu.transpose %20, [1, 0] : vector<32x128xf32> -> vector<128x32xf32>
    %28 = arith.truncf %27 : vector<128x32xf32> to vector<128x32xbf16>
    %c0_16 = arith.constant 0 : index
    %c0_17 = arith.constant 0 : index
    %29 = vector.load %arg25[%c0_16, %c0_17] : memref<8x32xf32, #tpu.memory_space<vmem>>, vector<8x32xf32>
    %30 = tpu.transpose %17, [1, 0] : vector<32x1xf32> -> vector<1x32xf32>
    %31 = vector.broadcast %30 : vector<1x32xf32> to vector<8x32xf32>
    %32 = arith.mulf %29, %31 : vector<8x32xf32>
    %cst_18 = arith.constant dense<0.000000e+00> : vector<8x32xf32>
    %33 = tpu.matmul %9, %28, %cst_18 {dimension_numbers = #tpu.dot_dimension_numbers<[1], [0], [0], [1], [0, 0, 1, 1], [], []>} : vector<8x128xbf16>, vector<128x32xbf16>, vector<8x32xf32> -> vector<8x32xf32>
    %34 = arith.addf %32, %33 : vector<8x32xf32>
    %c0_19 = arith.constant 0 : index
    %c0_20 = arith.constant 0 : index
    %35 = vector.load %arg25[%c0_19, %c0_20] : memref<8x32xf32, #tpu.memory_space<vmem>>, vector<8x32xf32>
    tpu.vector_store %arg25[%c0_19, %c0_20], %34 {strides = array<i32>} : memref<8x32xf32, #tpu.memory_space<vmem>>, vector<8x32xf32>,
    %c0_21 = arith.constant 0 : index
    %c0_22 = arith.constant 0 : index
    %36 = vector.load %arg23[%c0_21, %c0_22] : memref<32x1xf32, #tpu.memory_space<vmem>>, vector<32x1xf32>
    tpu.vector_store %arg23[%c0_21, %c0_22], %15 {strides = array<i32>} : memref<32x1xf32, #tpu.memory_space<vmem>>, vector<32x1xf32>,
    %c1_i32 = arith.constant 1 : i32
    %37 = arith.cmpi eq, %arg2, %c1_i32 : i32
    %38 = arith.extui %37 : i1 to i32
    %c0_i32_23 = arith.constant 0 : i32
    %39 = arith.cmpi ne, %38, %c0_i32_23 : i32
    scf.if %39 {
      %c0_27 = arith.constant 0 : index
      %c0_28 = arith.constant 0 : index
      %45 = vector.load %arg24[%c0_27, %c0_28] : memref<32x1xf32, #tpu.memory_space<vmem>>, vector<32x1xf32>
      %cst_29 = arith.constant 1.000000e+00 : f32
      %46 = vector.broadcast %cst_29 : f32 to vector<32x1xf32>
      %47 = arith.divf %46, %45 : vector<32x1xf32>
      %c0_30 = arith.constant 0 : index
      %c0_31 = arith.constant 0 : index
      %48 = vector.load %arg25[%c0_30, %c0_31] : memref<8x32xf32, #tpu.memory_space<vmem>>, vector<8x32xf32>
      %49 = tpu.transpose %48, [1, 0] : vector<8x32xf32> -> vector<32x8xf32>
      %50 = vector.broadcast %47 : vector<32x1xf32> to vector<32x8xf32>
      %51 = arith.mulf %49, %50 : vector<32x8xf32>
      %52 = arith.truncf %51 : vector<32x8xf32> to vector<32x8xbf16>
      %c0_32 = arith.constant 0 : index
      %c0_33 = arith.constant 0 : index
      %c0_34 = arith.constant 0 : index
      %53 = vector.load %arg9[%c0_32, %c0_33, %c0_34] : memref<1x1x32xf32, #tpu.memory_space<vmem>>, vector<1x1x32xf32>
      %54 = vector.shape_cast %53 : vector<1x1x32xf32> to vector<1x32xf32>
      %55 = vector.extract_strided_slice %52 {offsets = [0, 0], sizes = [8, 8], strides = [1, 1]} : vector<32x8xbf16> to vector<8x8xbf16>
      %c0_35 = arith.constant 0 : index
      %c0_36 = arith.constant 0 : index
      %c0_37 = arith.constant 0 : index
      %c0_38 = arith.constant 0 : index
      %56 = vector.load %arg8[%c0_35, %c0_36, %c0_37, %c0_38] : memref<1x4x8x32xbf16, #tpu.memory_space<vmem>>, vector<1x1x8x32xbf16>
      %57 = vector.shape_cast %56 : vector<1x1x8x32xbf16> to vector<8x32xbf16>
      %cst_39 = arith.constant dense<0.000000e+00> : vector<8x32xf32>
      %58 = tpu.matmul %55, %57, %cst_39 {dimension_numbers = #tpu.dot_dimension_numbers<[1], [0], [0], [1], [0, 0, 1, 1], [], []>} : vector<8x8xbf16>, vector<8x32xbf16>, vector<8x32xf32> -> vector<8x32xf32>
      %59 = vector.broadcast %54 : vector<1x32xf32> to vector<8x32xf32>
      %60 = arith.addf %59, %58 : vector<8x32xf32>
      %61 = vector.extract_strided_slice %52 {offsets = [8, 0], sizes = [8, 8], strides = [1, 1]} : vector<32x8xbf16> to vector<8x8xbf16>
      %c0_40 = arith.constant 0 : index
      %c1 = arith.constant 1 : index
      %c0_41 = arith.constant 0 : index
      %c0_42 = arith.constant 0 : index
      %62 = vector.load %arg8[%c0_40, %c1, %c0_41, %c0_42] : memref<1x4x8x32xbf16, #tpu.memory_space<vmem>>, vector<1x1x8x32xbf16>
      %63 = vector.shape_cast %62 : vector<1x1x8x32xbf16> to vector<8x32xbf16>
      %cst_43 = arith.constant dense<0.000000e+00> : vector<8x32xf32>
      %64 = tpu.matmul %61, %63, %cst_43 {dimension_numbers = #tpu.dot_dimension_numbers<[1], [0], [0], [1], [0, 0, 1, 1], [], []>} : vector<8x8xbf16>, vector<8x32xbf16>, vector<8x32xf32> -> vector<8x32xf32>
      %65 = arith.addf %60, %64 : vector<8x32xf32>
      %66 = vector.extract_strided_slice %52 {offsets = [16, 0], sizes = [8, 8], strides = [1, 1]} : vector<32x8xbf16> to vector<8x8xbf16>
      %c0_44 = arith.constant 0 : index
      %c2 = arith.constant 2 : index
      %c0_45 = arith.constant 0 : index
      %c0_46 = arith.constant 0 : index
      %67 = vector.load %arg8[%c0_44, %c2, %c0_45, %c0_46] : memref<1x4x8x32xbf16, #tpu.memory_space<vmem>>, vector<1x1x8x32xbf16>
      %68 = vector.shape_cast %67 : vector<1x1x8x32xbf16> to vector<8x32xbf16>
      %cst_47 = arith.constant dense<0.000000e+00> : vector<8x32xf32>
      %69 = tpu.matmul %66, %68, %cst_47 {dimension_numbers = #tpu.dot_dimension_numbers<[1], [0], [0], [1], [0, 0, 1, 1], [], []>} : vector<8x8xbf16>, vector<8x32xbf16>, vector<8x32xf32> -> vector<8x32xf32>
      %70 = arith.addf %65, %69 : vector<8x32xf32>
      %71 = vector.extract_strided_slice %52 {offsets = [24, 0], sizes = [8, 8], strides = [1, 1]} : vector<32x8xbf16> to vector<8x8xbf16>
      %c0_48 = arith.constant 0 : index
      %c3 = arith.constant 3 : index
      %c0_49 = arith.constant 0 : index
      %c0_50 = arith.constant 0 : index
      %72 = vector.load %arg8[%c0_48, %c3, %c0_49, %c0_50] : memref<1x4x8x32xbf16, #tpu.memory_space<vmem>>, vector<1x1x8x32xbf16>
      %73 = vector.shape_cast %72 : vector<1x1x8x32xbf16> to vector<8x32xbf16>
      %cst_51 = arith.constant dense<0.000000e+00> : vector<8x32xf32>
      %74 = tpu.matmul %71, %73, %cst_51 {dimension_numbers = #tpu.dot_dimension_numbers<[1], [0], [0], [1], [0, 0, 1, 1], [], []>} : vector<8x8xbf16>, vector<8x32xbf16>, vector<8x32xf32> -> vector<8x32xf32>
      %75 = arith.addf %70, %74 : vector<8x32xf32>
      %c0_52 = arith.constant 0 : index
      %c0_53 = arith.constant 0 : index
      %76 = vector.load %arg21[%c0_52, %c0_53] : memref<8x32xf32, #tpu.memory_space<vmem>>, vector<8x32xf32>
      %77 = arith.addf %75, %76 : vector<8x32xf32>
      %c0_54 = arith.constant 0 : index
      %c0_55 = arith.constant 0 : index
      %c0_56 = arith.constant 0 : index
      %78 = vector.load %arg10[%c0_54, %c0_55, %c0_56] : memref<1x1x32xf32, #tpu.memory_space<vmem>>, vector<1x1x32xf32>
      %79 = vector.shape_cast %78 : vector<1x1x32xf32> to vector<1x32xf32>
      %c0_57 = arith.constant 0 : index
      %c0_58 = arith.constant 0 : index
      %c0_59 = arith.constant 0 : index
      %80 = vector.load %arg11[%c0_57, %c0_58, %c0_59] : memref<1x1x32xf32, #tpu.memory_space<vmem>>, vector<1x1x32xf32>
      %81 = vector.shape_cast %80 : vector<1x1x32xf32> to vector<1x32xf32>
      %cst_60 = arith.constant dense<0.000000e+00> : vector<8xf32>
      %82 = vector.multi_reduction <add>, %77, %cst_60 [1] : vector<8x32xf32> to vector<8xf32>
      %83 = vector.shape_cast %82 : vector<8xf32> to vector<8x1xf32>
      %cst_61 = arith.constant 3.200000e+01 : f32
      %84 = vector.broadcast %cst_61 : f32 to vector<8x1xf32>
      %85 = arith.divf %83, %84 : vector<8x1xf32>
      %86 = vector.broadcast %85 : vector<8x1xf32> to vector<8x32xf32>
      %87 = arith.subf %77, %86 : vector<8x32xf32>
      %88 = arith.mulf %87, %87 : vector<8x32xf32>
      %cst_62 = arith.constant dense<0.000000e+00> : vector<8xf32>
      %89 = vector.multi_reduction <add>, %88, %cst_62 [1] : vector<8x32xf32> to vector<8xf32>
      %90 = vector.shape_cast %89 : vector<8xf32> to vector<8x1xf32>
      %cst_63 = arith.constant 3.200000e+01 : f32
      %91 = vector.broadcast %cst_63 : f32 to vector<8x1xf32>
      %92 = arith.divf %90, %91 : vector<8x1xf32>
      %93 = vector.broadcast %85 : vector<8x1xf32> to vector<8x32xf32>
      %94 = arith.subf %77, %93 : vector<8x32xf32>
      %cst_64 = arith.constant 9.99999974E-6 : f32
      %95 = vector.broadcast %cst_64 : f32 to vector<8x1xf32>
      %96 = arith.addf %92, %95 : vector<8x1xf32>
      %97 = math.rsqrt %96 : vector<8x1xf32>
      %98 = vector.broadcast %97 : vector<8x1xf32> to vector<8x32xf32>
      %99 = arith.mulf %94, %98 : vector<8x32xf32>
      %100 = vector.broadcast %79 : vector<1x32xf32> to vector<8x32xf32>
      %101 = arith.mulf %99, %100 : vector<8x32xf32>
      %102 = vector.broadcast %81 : vector<1x32xf32> to vector<8x32xf32>
      %103 = arith.addf %101, %102 : vector<8x32xf32>
      %c0_65 = arith.constant 0 : index
      %c0_66 = arith.constant 0 : index
      %c0_67 = arith.constant 0 : index
      %104 = vector.load %arg12[%c0_65, %c0_66, %c0_67] : memref<1x1x32xf32, #tpu.memory_space<vmem>>, vector<1x1x32xf32>
      %105 = vector.shape_cast %104 : vector<1x1x32xf32> to vector<1x32xf32>
      %c0_68 = arith.constant 0 : index
      %c0_69 = arith.constant 0 : index
      %c0_70 = arith.constant 0 : index
      %106 = vector.load %arg13[%c0_68, %c0_69, %c0_70] : memref<1x1x32xf32, #tpu.memory_space<vmem>>, vector<1x1x32xf32>
      %107 = vector.shape_cast %106 : vector<1x1x32xf32> to vector<1x32xf32>
      %cst_71 = arith.constant dense<0.000000e+00> : vector<8xf32>
      %108 = vector.multi_reduction <add>, %103, %cst_71 [1] : vector<8x32xf32> to vector<8xf32>
      %109 = vector.shape_cast %108 : vector<8xf32> to vector<8x1xf32>
      %cst_72 = arith.constant 3.200000e+01 : f32
      %110 = vector.broadcast %cst_72 : f32 to vector<8x1xf32>
      %111 = arith.divf %109, %110 : vector<8x1xf32>
      %112 = vector.broadcast %111 : vector<8x1xf32> to vector<8x32xf32>
      %113 = arith.subf %103, %112 : vector<8x32xf32>
      %114 = arith.mulf %113, %113 : vector<8x32xf32>
      %cst_73 = arith.constant dense<0.000000e+00> : vector<8xf32>
      %115 = vector.multi_reduction <add>, %114, %cst_73 [1] : vector<8x32xf32> to vector<8xf32>
      %116 = vector.shape_cast %115 : vector<8xf32> to vector<8x1xf32>
      %cst_74 = arith.constant 3.200000e+01 : f32
      %117 = vector.broadcast %cst_74 : f32 to vector<8x1xf32>
      %118 = arith.divf %116, %117 : vector<8x1xf32>
      %119 = vector.broadcast %111 : vector<8x1xf32> to vector<8x32xf32>
      %120 = arith.subf %103, %119 : vector<8x32xf32>
      %cst_75 = arith.constant 9.99999974E-6 : f32
      %121 = vector.broadcast %cst_75 : f32 to vector<8x1xf32>
      %122 = arith.addf %118, %121 : vector<8x1xf32>
      %123 = math.rsqrt %122 : vector<8x1xf32>
      %124 = vector.broadcast %123 : vector<8x1xf32> to vector<8x32xf32>
      %125 = arith.mulf %120, %124 : vector<8x32xf32>
      %126 = vector.broadcast %105 : vector<1x32xf32> to vector<8x32xf32>
      %127 = arith.mulf %125, %126 : vector<8x32xf32>
      %128 = vector.broadcast %107 : vector<1x32xf32> to vector<8x32xf32>
      %129 = arith.addf %127, %128 : vector<8x32xf32>
      %130 = arith.truncf %129 : vector<8x32xf32> to vector<8x32xbf16>
      %c0_76 = arith.constant 0 : index
      %c0_77 = arith.constant 0 : index
      %c0_78 = arith.constant 0 : index
      %131 = vector.load %arg14[%c0_76, %c0_77, %c0_78] : memref<1x32x256xbf16, #tpu.memory_space<vmem>>, vector<1x32x256xbf16>
      %132 = vector.shape_cast %131 : vector<1x32x256xbf16> to vector<32x256xbf16>
      %cst_79 = arith.constant dense<0.000000e+00> : vector<8x256xf32>
      %133 = tpu.matmul %130, %132, %cst_79 {dimension_numbers = #tpu.dot_dimension_numbers<[1], [0], [0], [1], [0, 0, 1, 1], [], []>} : vector<8x32xbf16>, vector<32x256xbf16>, vector<8x256xf32> -> vector<8x256xf32>
      %c0_80 = arith.constant 0 : index
      %c0_81 = arith.constant 0 : index
      %c0_82 = arith.constant 0 : index
      %134 = vector.load %arg15[%c0_80, %c0_81, %c0_82] : memref<1x1x256xf32, #tpu.memory_space<vmem>>, vector<1x1x256xf32>
      %135 = vector.shape_cast %134 : vector<1x1x256xf32> to vector<1x256xf32>
      %136 = vector.broadcast %135 : vector<1x256xf32> to vector<8x256xf32>
      %137 = arith.addf %133, %136 : vector<8x256xf32>
      %138 = vector.extract_strided_slice %137 {offsets = [0, 0], sizes = [8, 128], strides = [1, 1]} : vector<8x256xf32> to vector<8x128xf32>
      %139 = vector.extract_strided_slice %137 {offsets = [0, 128], sizes = [8, 128], strides = [1, 1]} : vector<8x256xf32> to vector<8x128xf32>
      %140 = arith.mulf %139, %139 : vector<8x128xf32>
      %141 = arith.mulf %139, %140 : vector<8x128xf32>
      %cst_83 = arith.constant 4.471500e-02 : f32
      %142 = vector.broadcast %cst_83 : f32 to vector<8x128xf32>
      %143 = arith.mulf %142, %141 : vector<8x128xf32>
      %144 = arith.addf %139, %143 : vector<8x128xf32>
      %cst_84 = arith.constant 0.797884583 : f32
      %145 = vector.broadcast %cst_84 : f32 to vector<8x128xf32>
      %146 = arith.mulf %145, %144 : vector<8x128xf32>
      %147 = math.tanh %146 : vector<8x128xf32>
      %cst_85 = arith.constant 1.000000e+00 : f32
      %148 = vector.broadcast %cst_85 : f32 to vector<8x128xf32>
      %149 = arith.addf %148, %147 : vector<8x128xf32>
      %cst_86 = arith.constant 5.000000e-01 : f32
      %150 = vector.broadcast %cst_86 : f32 to vector<8x128xf32>
      %151 = arith.mulf %150, %149 : vector<8x128xf32>
      %152 = arith.mulf %139, %151 : vector<8x128xf32>
      %153 = arith.mulf %138, %152 : vector<8x128xf32>
      %154 = arith.truncf %153 : vector<8x128xf32> to vector<8x128xbf16>
      %c0_87 = arith.constant 0 : index
      %c0_88 = arith.constant 0 : index
      %c0_89 = arith.constant 0 : index
      %155 = vector.load %arg16[%c0_87, %c0_88, %c0_89] : memref<1x128x32xbf16, #tpu.memory_space<vmem>>, vector<1x128x32xbf16>
      %156 = vector.shape_cast %155 : vector<1x128x32xbf16> to vector<128x32xbf16>
      %cst_90 = arith.constant dense<0.000000e+00> : vector<8x32xf32>
      %157 = tpu.matmul %154, %156, %cst_90 {dimension_numbers = #tpu.dot_dimension_numbers<[1], [0], [0], [1], [0, 0, 1, 1], [], []>} : vector<8x128xbf16>, vector<128x32xbf16>, vector<8x32xf32> -> vector<8x32xf32>
      %c0_91 = arith.constant 0 : index
      %c0_92 = arith.constant 0 : index
      %c0_93 = arith.constant 0 : index
      %158 = vector.load %arg17[%c0_91, %c0_92, %c0_93] : memref<1x1x32xf32, #tpu.memory_space<vmem>>, vector<1x1x32xf32>
      %159 = vector.shape_cast %158 : vector<1x1x32xf32> to vector<1x32xf32>
      %160 = vector.broadcast %159 : vector<1x32xf32> to vector<8x32xf32>
      %161 = arith.addf %157, %160 : vector<8x32xf32>
      %162 = arith.addf %161, %103 : vector<8x32xf32>
      %c0_94 = arith.constant 0 : index
      %c0_95 = arith.constant 0 : index
      %c0_96 = arith.constant 0 : index
      %163 = vector.load %arg18[%c0_94, %c0_95, %c0_96] : memref<1x1x32xf32, #tpu.memory_space<vmem>>, vector<1x1x32xf32>
      %164 = vector.shape_cast %163 : vector<1x1x32xf32> to vector<1x32xf32>
      %c0_97 = arith.constant 0 : index
      %c0_98 = arith.constant 0 : index
      %c0_99 = arith.constant 0 : index
      %165 = vector.load %arg19[%c0_97, %c0_98, %c0_99] : memref<1x1x32xf32, #tpu.memory_space<vmem>>, vector<1x1x32xf32>
      %166 = vector.shape_cast %165 : vector<1x1x32xf32> to vector<1x32xf32>
      %cst_100 = arith.constant dense<0.000000e+00> : vector<8xf32>
      %167 = vector.multi_reduction <add>, %162, %cst_100 [1] : vector<8x32xf32> to vector<8xf32>
      %168 = vector.shape_cast %167 : vector<8xf32> to vector<8x1xf32>
      %cst_101 = arith.constant 3.200000e+01 : f32
      %169 = vector.broadcast %cst_101 : f32 to vector<8x1xf32>
      %170 = arith.divf %168, %169 : vector<8x1xf32>
      %171 = vector.broadcast %170 : vector<8x1xf32> to vector<8x32xf32>
      %172 = arith.subf %162, %171 : vector<8x32xf32>
      %173 = arith.mulf %172, %172 : vector<8x32xf32>
      %cst_102 = arith.constant dense<0.000000e+00> : vector<8xf32>
      %174 = vector.multi_reduction <add>, %173, %cst_102 [1] : vector<8x32xf32> to vector<8xf32>
      %175 = vector.shape_cast %174 : vector<8xf32> to vector<8x1xf32>
      %cst_103 = arith.constant 3.200000e+01 : f32
      %176 = vector.broadcast %cst_103 : f32 to vector<8x1xf32>
      %177 = arith.divf %175, %176 : vector<8x1xf32>
      %178 = vector.broadcast %170 : vector<8x1xf32> to vector<8x32xf32>
      %179 = arith.subf %162, %178 : vector<8x32xf32>
      %cst_104 = arith.constant 9.99999974E-6 : f32
      %180 = vector.broadcast %cst_104 : f32 to vector<8x1xf32>
      %181 = arith.addf %177, %180 : vector<8x1xf32>
      %182 = math.rsqrt %181 : vector<8x1xf32>
      %183 = vector.broadcast %182 : vector<8x1xf32> to vector<8x32xf32>
      %184 = arith.mulf %179, %183 : vector<8x32xf32>
      %185 = vector.broadcast %164 : vector<1x32xf32> to vector<8x32xf32>
      %186 = arith.mulf %184, %185 : vector<8x32xf32>
      %187 = vector.broadcast %166 : vector<1x32xf32> to vector<8x32xf32>
      %188 = arith.addf %186, %187 : vector<8x32xf32>
      %c0_105 = arith.constant 0 : index
      %c0_106 = arith.constant 0 : index
      %189 = vector.load %arg21[%c0_105, %c0_106] : memref<8x32xf32, #tpu.memory_space<vmem>>, vector<8x32xf32>
      tpu.vector_store %arg21[%c0_105, %c0_106], %188 {strides = array<i32>} : memref<8x32xf32, #tpu.memory_space<vmem>>, vector<8x32xf32>,
    } else {
    }
    %c1_i32_24 = arith.constant 1 : i32
    %40 = arith.cmpi eq, %arg2, %c1_i32_24 : i32
    %c1_i32_25 = arith.constant 1 : i32
    %41 = arith.cmpi eq, %arg1, %c1_i32_25 : i32
    %42 = arith.andi %40, %41 : i1
    %43 = arith.extui %42 : i1 to i32
    %c0_i32_26 = arith.constant 0 : i32
    %44 = arith.cmpi ne, %43, %c0_i32_26 : i32
    scf.if %44 {
      %c0_27 = arith.constant 0 : index
      %c0_28 = arith.constant 0 : index
      %45 = vector.load %arg21[%c0_27, %c0_28] : memref<8x32xf32, #tpu.memory_space<vmem>>, vector<8x32xf32>
      %c0_29 = arith.constant 0 : index
      %c0_30 = arith.constant 0 : index
      %c0_31 = arith.constant 0 : index
      %46 = vector.load %arg20[%c0_29, %c0_30, %c0_31] : memref<1x8x32xf32, #tpu.memory_space<vmem>>, vector<1x8x32xf32>
      %47 = vector.shape_cast %46 : vector<1x8x32xf32> to vector<8x32xf32>
      %48 = vector.shape_cast %45 : vector<8x32xf32> to vector<1x8x32xf32>
      tpu.vector_store %arg20[%c0_29, %c0_30, %c0_31], %48 {strides = array<i32>} : memref<1x8x32xf32, #tpu.memory_space<vmem>>, vector<1x8x32xf32>,
    } else {
    }
    return
  }
  func.func @transform_0(%arg0: i32, %arg1: i32, %arg2: i32) -> (i32, i32) {
    %c0_i32 = arith.constant 0 : i32
    %c0_i32_0 = arith.constant 0 : i32
    %c0_i32_1 = arith.constant 0 : i32
    return %c0_i32, %c0_i32_0 : i32, i32
  }
  func.func @transform_1(%arg0: i32, %arg1: i32, %arg2: i32) -> (i32, i32, i32) {
    %c0_i32 = arith.constant 0 : i32
    %c0_i32_0 = arith.constant 0 : i32
    return %arg0, %c0_i32, %arg2 : i32, i32, i32
  }
  func.func @transform_2(%arg0: i32, %arg1: i32, %arg2: i32) -> (i32, i32, i32) {
    %c0_i32 = arith.constant 0 : i32
    %c0_i32_0 = arith.constant 0 : i32
    %c0_i32_1 = arith.constant 0 : i32
    return %arg1, %c0_i32, %c0_i32_0 : i32, i32, i32
  }
  func.func @transform_3(%arg0: i32, %arg1: i32, %arg2: i32) -> (i32, i32, i32) {
    %c0_i32 = arith.constant 0 : i32
    %c0_i32_0 = arith.constant 0 : i32
    %c0_i32_1 = arith.constant 0 : i32
    return %arg1, %c0_i32, %c0_i32_0 : i32, i32, i32
  }
  func.func @transform_4(%arg0: i32, %arg1: i32, %arg2: i32) -> (i32, i32, i32, i32) {
    %c0_i32 = arith.constant 0 : i32
    %c0_i32_0 = arith.constant 0 : i32
    %c0_i32_1 = arith.constant 0 : i32
    %c0_i32_2 = arith.constant 0 : i32
    return %arg1, %c0_i32, %c0_i32_0, %c0_i32_1 : i32, i32, i32, i32
  }
  func.func @transform_5(%arg0: i32, %arg1: i32, %arg2: i32) -> (i32, i32, i32, i32) {
    %c0_i32 = arith.constant 0 : i32
    %c0_i32_0 = arith.constant 0 : i32
    %c0_i32_1 = arith.constant 0 : i32
    %c0_i32_2 = arith.constant 0 : i32
    return %arg1, %c0_i32, %c0_i32_0, %c0_i32_1 : i32, i32, i32, i32
  }
  func.func @transform_6(%arg0: i32, %arg1: i32, %arg2: i32) -> (i32, i32, i32) {
    %c0_i32 = arith.constant 0 : i32
    %c0_i32_0 = arith.constant 0 : i32
    %c0_i32_1 = arith.constant 0 : i32
    return %arg1, %c0_i32, %c0_i32_0 : i32, i32, i32
  }
  func.func @transform_7(%arg0: i32, %arg1: i32, %arg2: i32) -> (i32, i32, i32) {
    %c0_i32 = arith.constant 0 : i32
    %c0_i32_0 = arith.constant 0 : i32
    %c0_i32_1 = arith.constant 0 : i32
    return %arg1, %c0_i32, %c0_i32_0 : i32, i32, i32
  }
  func.func @transform_8(%arg0: i32, %arg1: i32, %arg2: i32) -> (i32, i32, i32) {
    %c0_i32 = arith.constant 0 : i32
    %c0_i32_0 = arith.constant 0 : i32
    %c0_i32_1 = arith.constant 0 : i32
    return %arg1, %c0_i32, %c0_i32_0 : i32, i32, i32
  }
  func.func @transform_9(%arg0: i32, %arg1: i32, %arg2: i32) -> (i32, i32, i32) {
    %c0_i32 = arith.constant 0 : i32
    %c0_i32_0 = arith.constant 0 : i32
    %c0_i32_1 = arith.constant 0 : i32
    return %arg1, %c0_i32, %c0_i32_0 : i32, i32, i32
  }
  func.func @transform_10(%arg0: i32, %arg1: i32, %arg2: i32) -> (i32, i32, i32) {
    %c0_i32 = arith.constant 0 : i32
    %c0_i32_0 = arith.constant 0 : i32
    %c0_i32_1 = arith.constant 0 : i32
    return %arg1, %c0_i32, %c0_i32_0 : i32, i32, i32
  }
  func.func @transform_11(%arg0: i32, %arg1: i32, %arg2: i32) -> (i32, i32, i32) {
    %c0_i32 = arith.constant 0 : i32
    %c0_i32_0 = arith.constant 0 : i32
    %c0_i32_1 = arith.constant 0 : i32
    return %arg1, %c0_i32, %c0_i32_0 : i32, i32, i32
  }
  func.func @transform_12(%arg0: i32, %arg1: i32, %arg2: i32) -> (i32, i32, i32) {
    %c0_i32 = arith.constant 0 : i32
    %c0_i32_0 = arith.constant 0 : i32
    %c0_i32_1 = arith.constant 0 : i32
    return %arg1, %c0_i32, %c0_i32_0 : i32, i32, i32
  }
  func.func @transform_13(%arg0: i32, %arg1: i32, %arg2: i32) -> (i32, i32, i32) {
    %c0_i32 = arith.constant 0 : i32
    %c0_i32_0 = arith.constant 0 : i32
    %c0_i32_1 = arith.constant 0 : i32
    return %arg1, %c0_i32, %c0_i32_0 : i32, i32, i32
  }
  func.func @transform_14(%arg0: i32, %arg1: i32, %arg2: i32) -> (i32, i32, i32) {
    %c0_i32 = arith.constant 0 : i32
    %c0_i32_0 = arith.constant 0 : i32
    %c0_i32_1 = arith.constant 0 : i32
    return %arg1, %c0_i32, %c0_i32_0 : i32, i32, i32
  }
  func.func @transform_15(%arg0: i32, %arg1: i32, %arg2: i32) -> (i32, i32, i32) {
    %c0_i32 = arith.constant 0 : i32
    %c0_i32_0 = arith.constant 0 : i32
    %c0_i32_1 = arith.constant 0 : i32
    return %arg1, %c0_i32, %c0_i32_0 : i32, i32, i32
  }
  func.func @transform_16(%arg0: i32, %arg1: i32, %arg2: i32) -> (i32, i32, i32) {
    %c0_i32 = arith.constant 0 : i32
    %c0_i32_0 = arith.constant 0 : i32
    %c0_i32_1 = arith.constant 0 : i32
    return %arg1, %c0_i32, %c0_i32_0 : i32, i32, i32
  }
  func.func @transform_17(%arg0: i32, %arg1: i32, %arg2: i32) -> (i32, i32, i32) {
    %c0_i32 = arith.constant 0 : i32
    %c0_i32_0 = arith.constant 0 : i32
    %c0_i32_1 = arith.constant 0 : i32
    return %arg0, %c0_i32, %c0_i32_0 : i32, i32, i32
  }
}

</mosaic_0001>

<bundles_post_ra>
// kernel: tpu_custom_call.1
= control target key start
LH: loop header
LB: loop body
LE: loop exit
PB: predicated region body
PF: predicated region fallthrough
CT: control target
= control target key end

     0   :  { %s3232_s0 = inlined_call_operand.vmem [shape: f32[8,32], index: 0, kind: input, shape index: {}]   ;;  %s3233_s1 = inlined_call_operand.vmem [shape: bf16[2,8,256], index: 1, kind: input, shape index: {}]   ;;  %s3234_s2 = inlined_call_operand.vmem [shape: f32[2,1,32], index: 2, kind: input, shape index: {}]   ;;  %s3235_s3 = inlined_call_operand.vmem [shape: f32[2,1,32], index: 3, kind: input, shape index: {}]   ;;  %s3236_s4 = inlined_call_operand.vmem [shape: bf16[2,4,32,8], index: 4, kind: input, shape index: {}]   ;;  %s3237_s5 = inlined_call_operand.vmem [shape: bf16[2,4,8,32], index: 5, kind: input, shape index: {}]   ;;  %s3238_s6 = inlined_call_operand.vmem [shape: f32[2,1,32], index: 6, kind: input, shape index: {}]   ;;  %s3239_s7 = inlined_call_operand.vmem [shape: f32[2,1,32], index: 7, kind: input, shape index: {}]   ;;  %s3240_s8 = inlined_call_operand.vmem [shape: f32[2,1,32], index: 8, kind: input, shape index: {}]   ;;  %s3241_s9 = inlined_call_operand.vmem [shape: f32[2,1,32], index: 9, kind: input, shape index: {}]   ;;  %s3242_s10 = inlined_call_operand.vmem [shape: f32[2,1,32], index: 10, kind: input, shape index: {}]   ;;  %s3243_s11 = inlined_call_operand.vmem [shape: bf16[2,32,256], index: 11, kind: input, shape index: {}]   ;;  %s3244_s12 = inlined_call_operand.vmem [shape: f32[2,1,256], index: 12, kind: input, shape index: {}]   ;;  %s3245_s13 = inlined_call_operand.vmem [shape: bf16[2,128,32], index: 13, kind: input, shape index: {}]   ;;  %s3246_s14 = inlined_call_operand.vmem [shape: f32[2,1,32], index: 14, kind: input, shape index: {}]   ;;  %s3247_s15 = inlined_call_operand.vmem [shape: f32[2,1,32], index: 15, kind: input, shape index: {}]   ;;  %s3248_s16 = inlined_call_operand.vmem [shape: f32[2,1,32], index: 16, kind: input, shape index: {}]   ;;  %s3249_s17 = inlined_call_operand.hbm [shape: f32[2,8,32], index: 17, kind: output, shape index: {}]  }
   0x1   :  { %3270 = sst [smem:[#allocation29_spill]] %s3232_s0 }
   0x2   :  { %3271 = sst [smem:[#allocation30_spill]] %s3233_s1 }
   0x3   :  { %3272 = sst [smem:[#allocation31_spill]] %s3234_s2 }
   0x4   :  { %3273 = sst [smem:[#allocation32_spill]] %s3235_s3 }
   0x5   :  { %3274 = sst [smem:[#allocation33_spill]] %s3236_s4 }
   0x6   :  { %3275 = sst [smem:[#allocation34_spill]] %s3237_s5 }
   0x7   :  { %3276 = sst [smem:[#allocation35_spill]] %s3243_s11 }
   0x8   :  { %3277 = sst [smem:[#allocation36_spill]] %s3248_s16 }
   0x9   :  { %3278 = sst [smem:[#allocation37_spill]] %s3249_s17 }
   0xa   :  { %22 = vsyncpa [#allocation8], 0 }
   0xb   :  { %24 = vsyncpa [#allocation8 + $0x1], 0  ;;  %s2820_s24 = smov 0   ;;  %s2822_s25 = smov 0  }
   0xc   :  { %s2824_s26 = smov 0   ;;  %s2826_s27 = smov 0  }
   0xd   :  { %s2828_s28 = smov 0   ;;  %s2830_s29 = smov 0  }
   0xe   :  { %s2832_s0 = smov 0   ;;  %s2834_s30 = smov 0  }
   0xf   :  { %s2836_s18 = smov 0   ;;  %s2838_s19 = smov 0  }
  0x10 LB: > { %3279 = sst [smem:[#allocation10_spill]] %s2682_s24  ;;  %s2223_s1 = sadd.s32 4294967295, %s2718_s19   ;;  %s2718_s19 = sphi %s2838_s19, %s30_s19   ;;  %s2714_s18 = sphi %s2836_s18, %s3343_s18   ;;  %s2710_s30 = sphi %s2834_s30, %s3342_s30   ;;  %s2706_s0 = sphi %s2832_s0, %s3341_s0   ;;  %s2702_s29 = sphi %s2830_s29, %s3340_s29   ;;  %s2698_s28 = sphi %s2828_s28, %s3339_s28   ;;  %s2694_s27 = sphi %s2826_s27, %s3338_s27   ;;  %s2690_s26 = sphi %s2824_s26, %s3337_s26   ;;  %s2686_s25 = sphi %s2822_s25, %s3336_s25   ;;  %s2682_s24 = sphi %s2820_s24, %s3335_s24  }
  0x11   : > { %3280 = sst [smem:[#allocation11_spill]] %s2686_s25  ;;  %s2224_s20 = sadd.s32 4294967294, %s2718_s19  }
  0x12   : > { %3281 = sst [smem:[#allocation12_spill]] %s2690_s26  ;;  %s42_s21 = sadd.s32 1, %s2706_s0 }
  0x13   : > { %3282 = sst [smem:[#allocation13_spill]] %s2694_s27  ;;  %p43_p0 = scmp.ge.s32.totalorder %s42_s21, 2 }
  0x14   : > { %3283 = sst [smem:[#allocation14_spill]] %s2698_s28  ;;  %s45_s22 = sadd.s32 1, %s2710_s30 }
  0x15   : > { %3284 = sst [smem:[#allocation15_spill]] %s2702_s29  ;;  %s49_s23 = sadd.s32 1, %s2714_s18 }
  0x16   : > { %3285 = sst [smem:[#allocation16_spill]] %s2706_s0  ;;  %p505_p1 = scmp.ne.s32.totalorder %s2690_s26, %s2686_s25 }
  0x17   : > { %3286 = sst [smem:[#allocation17_spill]] %s2710_s30  ;;  %s3345_s21 = smov (%p43_p0, %s42_s21), 0 }
  0x18   : > { %3287 = sst [smem:[#allocation18_spill]] %s2714_s18  ;;  %s3347_s22 = smov (!%p43_p0, %s45_s22), %s2710_s30 }
  0x19   : > { %3288 = sst [smem:[#allocation19_spill]] %s2718_s19  ;;  %p506_p2 = scmp.eq.s32.totalorder %s2223_s1, 7 }
  0x1a   : > { %3289 = sst [smem:[#allocation20_spill]] %s3345_s21  ;;  %p511_p3 = scmp.ne.s32.totalorder %s2686_s25, %s2682_s24 }
  0x1b   : > { %p47_p4 = scmp.ge.s32.totalorder %s3347_s22, 2  ;;  %p512_p5 = scmp.eq.s32.totalorder %s2224_s20, 7 }
  0x1c   : > { %p2882_p6 = por %p506_p2, %p505_p1  ;;  %p2227_p7 = scmp.ge.s32.totalorder %s2718_s19, 1 }
  0x1d   : > { %s3349_s22 = smov (%p47_p4, %s3347_s22), 0  ;;  %s3351_s23 = smov (!%p47_p4, %s49_s23), %s2714_s18 }
  0x1e   : > { %s3290_s17 = scalar_select %p2882_p6, 1, 0 }
  0x1f   : > { %3292 = sst [smem:[#allocation22_spill]] %s3349_s22  ;;  %p2890_p8 = por %p512_p5, %p511_p3 }
  0x20   : > { %3291 = sst [smem:[#allocation21_spill]] %s3290_s17  ;;  %p643_p9 = scmp.lt.s32.totalorder %s2718_s19, 9 }
  0x21   : > { %s3293_s0 = scalar_select %p2890_p8, 1, 0 }
  0x22   : > { %p51_p10 = scmp.ge.s32.totalorder %s3351_s23, 2  ;;  %p644_p11 = pnand %p2227_p7, %p643_p9 }
  0x23   : > { %3294 = sst [smem:[#allocation23_spill]] %s3293_s0  ;;  %s495_s20 = sadd.s32 1, %s2690_s26 }
  0x24   : > { %s3353_s23 = smov (%p51_p10, %s3351_s23), 0 }
  0x25   : > { %3295 = sst [smem:[#allocation24_spill]] %s3353_s23  ;;  %s492_s1 = ssub.s32 %s2714_s18, %s3353_s23 }
  0x26   : > { %p493_p12 = scmp.eq.s32.totalorder %s492_s1, 0  ;;  %647 = sbr.rel (%p644_p11) target bundleno = 3301 (0xce5), region = 88 }
  0x28   : > { %s2901_s21 = scalar_select %p493_p12, %s2690_s26, %s495_s20  }
  0x2a   : > { %3296 = sst [smem:[#allocation25_spill]] %s2901_s21 }
  0x2b   : > { %s3262_s22 = sand.u32 1, %s2686_s25   ;;  %p752_p13 = scmp.lt.s32.totalorder %s2702_s29, 1 }
  0x2c   : > { %s2907_s30 = sshll.u32 %s3262_s22, 3  ;;  %p754_p0 = scmp.lt.s32.totalorder %s2694_s27, 1 }
  0x2d   : > { %p760_p1 = scmp.lt.s32.totalorder %s2698_s28, 1  ;;  %p815_p2 = scmp.eq.s32.totalorder %s2698_s28, 0 }
  0x2e   : > { %s753_s1 = scalar_select %p752_p13, %s2702_s29, 1 }
  0x2f   : > { %s755_s20 = scalar_select %p754_p0, %s2694_s27, 1 }
  0x30   : > { %s2229_s23 = sshll.u32 %s753_s1, 1  ;;  %p816_p3 = scmp.eq.s32.totalorder %s2694_s27, 0 }
  0x31   : > { %s757_s18 = sadd.s32 %s2229_s23, %s755_s20  ;;  %s3297_s24 = sld [smem:[#allocation30_spill]] }
  0x32   : > { %s2230_s21 = sshll.u32 %s757_s18, 2  ;;  %p2920_p4 = pnand %p816_p3, %p815_p2 }
  0x33   : > { %s2925_s22 = scalar_select %p760_p1, %s2698_s28, 1 }
  0x34   : > { %s3299_s17 = scalar_select %p2920_p4, 1, 0 }
  0x35   : > { %s2305_s25 = sshll.u32 %s2925_s22, 4  ;;  %s3303_s4 = sld [smem:[#allocation33_spill]] }
  0x36   : > { %3300 = sst [smem:[#allocation27_spill]] %s3299_s17  ;;  %s2306_s20 = sshll.u32 %s2925_s22, 5 }
  0x37   : > { %s2918_s19 = scalar_lea.vmem %s3297_s24, %s2230_s21  ;;  %s2304_s21 = sshll.u32 %s2925_s22, 6 }
  0x38   : > { %3298 = sst [smem:[#allocation26_spill]] %s2918_s19  ;;  %s2237_s18 = sshll.u32 %s2925_s22, 1 }
  0x39   : > { %s3305_s5 = sld [smem:[#allocation34_spill]]  ;;  %s2977_s17 = scalar_lea.vmem %s3244_s12, %s2237_s18 }
  0x3a   : > { %s3306_s11 = sld [smem:[#allocation35_spill]]  ;;  %s807_s28 = scalar_lea.vmem %s3246_s14, %s2925_s22 }
  0x3b   : > { %s2940_s1 = scalar_lea.vmem %s3303_s4, %s2304_s21  ;;  %s2982_s4 = scalar_lea.vmem %s3245_s13, %s2304_s21 }
  0x3c   : > { %3304 = sst [smem:[#allocation28_spill]] %s2940_s1  ;;  %s751_s3 = scalar_lea.vmem [#allocation7], %s2907_s30 }
  0x3d   : > { %s3307_s26 = sld [smem:[#allocation36_spill]] }
  0x3e   : > { %s3309_s21 = sld [smem:[#allocation29_spill]] (!%p2920_p4) }
  0x3f   : > { %s2945_s19 = scalar_lea.vmem %s3305_s5, %s2305_s25  ;;  %s810_s5 = scalar_lea.vmem %s3247_s15, %s2925_s22 }
  0x40   : > { %s2971_s24 = scalar_lea.vmem %s3306_s11, %s2306_s20  ;;  %820 = sbr.rel (%p2920_p4) target bundleno = 71 (0x47), region = 92 }
  0x43   : > { %s813_s11 = scalar_lea.vmem %s3307_s26, %s2925_s22 }
  0x45   : > { %v821_v0 = vld [vmem:[%s3309_s21] sm:$0xff]  ;;  %vm822_vm0 = vcmask 261120  }
  0x46   : > { %823 = vst.msk [vmem:[#allocation2] sm:$0xff] %vm822_vm0, %v821_v0 }
  0x47 PF: > { %s3310_s27 = sld [smem:[#allocation13_spill]] }
  0x4d   : > { %p2240_p5 = scmp.ne.s32.totalorder %s3310_s27, 0 }
  0x4e   : > { %s3311_s1 = sld [smem:[#allocation28_spill]] (!%p2240_p5) }
  0x4f   : > { %826 = sbr.rel (%p2240_p5) target bundleno = 602 (0x25a), region = 96  ;;  %s3312_s23 = sld [smem:[#allocation31_spill]] (!%p2240_p5) }
  0x50   : > { %s3314_s18 = sld [smem:[#allocation32_spill]] (!%p2240_p5) }
  0x54   : > { %v827_v1 = vld [vmem:[#allocation2] sm:$0xff]  ;;  %vm830_vm1 = vcmask 261120   ;;  %vm1099_vm2 = vcmask 7168   ;;  %v2720_v3 = vmov -1e+30   ;;  %v2721_v4 = vmov 0.0  }
  0x55   : > { %v831_v2 = vsel %vm830_vm1, %v827_v1, 0.0  ;;  %1100 = vst.msk [vmem:[#allocation4] sm:$0xff] %vm1099_vm2, %v2720_v3  ;;  %1101 = vst.msk [vmem:[#allocation4 + $0x8] sm:$0xff] %vm1099_vm2, %v2720_v3  ;;  %2349 = vmatprep.subr.bf16.mxu0 %v2721_v4  ;;  %2357 = vmatprep.subr.bf16.mxu1 %v2721_v4  ;;  %v2548_v10 = vld [vmem:[%s3311_s1 + $0x8] sm:$0xff]   ;;  %v2549_v11 = vld [vmem:[%s3311_s1 + $0x18] sm:$0xff]   ;;  %vm2722_vm3 = vmmov 0   ;;  %s3313_s16 = scalar_lea.vmem %s3312_s23, %s2925_s22 }
  0x56   : > { %1102 = vst.msk [vmem:[#allocation4 + $0x10] sm:$0xff] %vm1099_vm2, %v2720_v3  ;;  %1103 = vst.msk [vmem:[#allocation4 + $0x18] sm:$0xff] %vm1099_vm2, %v2720_v3  ;;  %832 = vadd.xlane.f32.xlu0 %v831_v2  ;;  %2353 = vmatprep.mubr.msk.bf16.mxu0 %vm2722_vm3, %v2721_v4  ;;  %v2550_v12 = vld [vmem:[%s3311_s1] sm:$0xff]   ;;  %v2551_v13 = vld [vmem:[%s3311_s1 + $0x10] sm:$0xff]   ;;  %s3315_s0 = scalar_lea.vmem %s3314_s18, %s2925_s22  ;;  %vm920_vm4 = vcmask 60416  }
  0x57   : > { %1104 = vst.msk [vmem:[#allocation5] sm:$0xff] %vm1099_vm2, %v2721_v4  ;;  %1105 = vst.msk [vmem:[#allocation5 + $0x8] sm:$0xff] %vm1099_vm2, %v2721_v4  ;;  %2361 = vmatprep.mubr.msk.bf16.mxu1 %vm2722_vm3, %v2721_v4  ;;  %2350 = vmatpush3.bf16.msra.mxu0 %v2548_v10  ;;  %v2241_v18 = vld [vmem:[%s3313_s16] ss:$0 sm:$0xff]  ;;  %v2552_v23 = vld [vmem:[%s3311_s1 + $0x28] sm:$0xff]  }
  0x58   : > { %1106 = vst.msk [vmem:[#allocation5 + $0x10] sm:$0xff] %vm1099_vm2, %v2721_v4  ;;  %1107 = vst.msk [vmem:[#allocation5 + $0x18] sm:$0xff] %vm1099_vm2, %v2721_v4  ;;  %2358 = vmatpush3.bf16.msra.mxu1 %v2549_v11  ;;  %2351 = vmatprep.subr.bf16.mxu0 %v2721_v4  ;;  %v2242_v20 = vld [vmem:[%s3315_s0] ss:$0 sm:$0xff]  ;;  %v2553_v24 = vld [vmem:[%s3311_s1 + $0x38] sm:$0xff]  }
  0x59   : > { %1108 = vst.msk [vmem:[#allocation6] sm:$0xff] %vm830_vm1, %v2721_v4  ;;  %2359 = vmatprep.subr.bf16.mxu1 %v2721_v4  ;;  %v2554_v26 = vld [vmem:[%s3311_s1 + $0x20] sm:$0xff]   ;;  %v2555_v27 = vld [vmem:[%s3311_s1 + $0x30] sm:$0xff]  }
  0x5b   : > { %2352 = vmatpush3.bf16.msra.mxu0 %v2550_v12 }
  0x5c   : > { %2360 = vmatpush3.bf16.msra.mxu1 %v2551_v13  ;;  %2365 = vmatprep.subr.bf16.mxu0 %v2721_v4 }
  0x5d   : > { %2373 = vmatprep.subr.bf16.mxu1 %v2721_v4 }
  0xdf   : > { %v833_v5 = vpop.xlane.xlu0 %832 }
  0xe0   : > { %v835_v6 = vmul.f32 0.03125, %v833_v5 }
  0xe2   : > { %v836_v7 = vsub.f32 %v827_v1, %v835_v6 }
  0xe4   : > { %v837_v8 = vmul.f32 %v836_v7, %v836_v7 }
  0xe6   : > { %v838_v9 = vsel %vm830_vm1, %v837_v8, 0.0 }
  0xe7   : > { %839 = vadd.xlane.f32.xlu0 %v838_v9 }
 0x170   : > { %v840_v14 = vpop.xlane.xlu0 %839 }
 0x171   : > { %v841_v15 = vmul.f32 0.03125, %v840_v14 }
 0x173   : > { %v842_v16 = vadd.f32 1e-05, %v841_v15 }
 0x175   : > { %2556 = vrsqrt.f32 %v842_v16 }
 0x182   : > { %v2557_v17 = vpop.eup %2556 }
 0x183   : > { %v844_v19 = vmul.f32 %v2557_v17, %v836_v7 }
 0x185   : > { %v851_v21 = vmul.f32 %v2241_v18, %v844_v19 }
 0x187   : > { %v858_v22 = vadd.f32 %v2242_v20, %v851_v21 }
 0x189   : > { %v859_v25 = vpack.c.bf16 %v858_v22, %v858_v22 }
 0x18b   : > { %2354 = vmatmul.mubr.msk.bf16.vlgmr.msra.gmra.mxu0 %vm830_vm1, %v859_v25  ;;  %2362 = vmatmul.mubr.msk.bf16.vlgmr.msra.gmra.mxu1 %vm830_vm1, %v859_v25 }
 0x18c   : > { %2366 = vmatpush3.bf16.msra.mxu0 %v2552_v23  ;;  %2374 = vmatpush3.bf16.msra.mxu1 %v2553_v24 }
 0x18d   : > { %2367 = vmatprep.subr.bf16.mxu0 %v2721_v4  ;;  %2375 = vmatprep.subr.bf16.mxu1 %v2721_v4 }
 0x18e   : > { %2369 = vmatprep.mubr.msk.bf16.mxu0 %vm2722_vm3, %v2721_v4  ;;  %2377 = vmatprep.mubr.msk.bf16.mxu1 %vm2722_vm3, %v2721_v4 }
 0x190   : > { %2368 = vmatpush3.bf16.msra.mxu0 %v2554_v26  ;;  %2376 = vmatpush3.bf16.msra.mxu1 %v2555_v27 }
 0x193   : > { %2370 = vmatmul.mubr.msk.bf16.vlgmr.msra.gmra.mxu0 %vm830_vm1, %v859_v25  ;;  %2378 = vmatmul.mubr.msk.bf16.vlgmr.msra.gmra.mxu1 %vm830_vm1, %v859_v25 }
 0x24b   : > { %v913_v28 = vpop.f32.mrf.mxu0  ;;  %v973_v29 = vpop.f32.mrf.mxu1 }
 0x24c   : > { %v919_v30 = vpack.c.bf16 %v913_v28, %v913_v28  ;;  %v979_v31 = vpack.c.bf16 %v973_v29, %v973_v29 }
 0x24d   : > { %v2355_v32 = vpop.f32.mrf.mxu0  ;;  %v2363_v33 = vpop.f32.mrf.mxu1 }
 0x24e   : > { %921 = vst.msk [vmem:[#allocation3] sm:$0xf] %vm920_vm4, %v919_v30  ;;  %980 = vst.msk [vmem:[#allocation3 + $0x4] sm:$0xf] %vm920_vm4, %v979_v31 }
 0x24f   : > { %v916_v34 = vpop.f32.mrf.mxu0  ;;  %v976_v35 = vpop.f32.mrf.mxu1 }
 0x251   : > { %v2356_v36 = vpop.f32.mrf.mxu0  ;;  %v2364_v37 = vpop.f32.mrf.mxu1 }
 0x253   : > { %v1032_v38 = vpop.f32.mrf.mxu0  ;;  %v1091_v39 = vpop.f32.mrf.mxu1 }
 0x254   : > { %v1038_v40 = vpack.c.bf16 %v1032_v38, %v1032_v38  ;;  %v1097_v41 = vpack.c.bf16 %v1091_v39, %v1091_v39 }
 0x255   : > { %v2371_v42 = vpop.f32.mrf.mxu0  ;;  %v2379_v43 = vpop.f32.mrf.mxu1 }
 0x256   : > { %1039 = vst.msk [vmem:[#allocation3 + $0x8] sm:$0xf] %vm920_vm4, %v1038_v40  ;;  %1098 = vst.msk [vmem:[#allocation3 + $0xc] sm:$0xf] %vm920_vm4, %v1097_v41 }
 0x257   : > { %v1035_v44 = vpop.f32.mrf.mxu0  ;;  %v1094_v45 = vpop.f32.mrf.mxu1 }
 0x259   : > { %v2372_v46 = vpop.f32.mrf.mxu0  ;;  %v2380_v47 = vpop.f32.mrf.mxu1 }
 0x25a PF: > { %s3316_s29 = sld [smem:[#allocation26_spill]]  ;;  %vm1131_vm5 = vcmask 1043456   ;;  %v2560_v49 = vld [vmem:[#allocation3] sm:$0xff]   ;;  %vm1124_vm6 = vcmask 64512   ;;  %v2723_v56 = vmov 0   ;;  %vm1264_vm7 = vcmask 7168  }
 0x25b   : > { %2383 = vmatprep.mubr.msk.bf16.mxu0 %vm1124_vm6, %v2560_v49  ;;  %2559 = vset.pattern.permute.xlu1 %v2723_v56  ;;  %v1186_v57 = vld [vmem:[#allocation4 + $0x10] sm:$0xff]  ;;  %v1184_v59 = vld [vmem:[#allocation4] sm:$0xff]  ;;  %v1187_v62 = vld [vmem:[#allocation4 + $0x18] sm:$0xff]  ;;  %v2724_v31 = vmov 0.0   ;;  %vm2725_vm8 = vmmov 0   ;;  %s3317_s21 = sld [smem:[#allocation13_spill]] }
 0x25c   : > { %2558 = vset.pattern.permute.xlu0 %v2723_v56  ;;  %v1185_v2 = vld [vmem:[#allocation4 + $0x8] sm:$0xff]  ;;  %2387 = vmatprep.subr.bf16.mxu1 %v2724_v31  ;;  %v1244_v38 = vld [vmem:[#allocation5] sm:$0xff]  ;;  %v1247_v49 = vld [vmem:[#allocation5 + $0x18] sm:$0xff]  ;;  %vm1388_vm9 = vcmask 261120  }
 0x25d   : > { %v2561_v51 = vld [vmem:[#allocation3 + $0x8] sm:$0xff]   ;;  %2403 = vmatprep.mubr.msk.bf16.mxu1 %vm2725_vm8, %v2724_v31  ;;  %v1245_v43 = vld [vmem:[#allocation5 + $0x8] sm:$0xff] }
 0x260   : > { %v3037_v48 = vld [vmem:[%s3316_s29] sm:$0xf] }
 0x261   : > { %2451 = vmatprep.subr.msk.bf16.mxu0 %vm1131_vm5, %v3037_v48  ;;  %v1133_v50 = vsel %vm1131_vm5, %v3037_v48, 0  ;;  %p1394_p7 = scmp.eq.s32.totalorder %s3317_s21, 1  ;;  %p2271_p9 = scmp.ne.s32.totalorder %s3317_s21, 1 }
 0x262   : > { %2382 = vmatpush3.bf16.msra.mxu0 %v1133_v50  ;;  %s3318_s1 = scalar_lea.vmem (!%p2271_p9), %s3238_s6, %s2925_s22  ;;  %s3319_s23 = scalar_lea.vmem (!%p2271_p9), %s3239_s7, %s2925_s22 }
 0x263   : > { %s3320_s2 = scalar_lea.vmem (!%p2271_p9), %s3240_s8, %s2925_s22  ;;  %s3321_s29 = scalar_lea.vmem (!%p2271_p9), %s3241_s9, %s2925_s22 }
 0x265   : > { %2384 = vmatmul.mubr.msk.bf16.vlgmr.msra.gmra.mxu0 %vm1124_vm6, %v2561_v51 }
 0x325   : > { %v2385_v52 = vpop.f32.mrf.mxu0 }
 0x326   : > { %1192 = vmax.xlane.f32.xlu1 %v2385_v52 }
 0x327   : > { %v1169_v53 = vpop.f32.mrf.mxu0 }
 0x328   : > { %1188 = vmax.xlane.f32.xlu0 %v1169_v53 }
 0x329   : > { %v2386_v54 = vpop.f32.mrf.mxu0 }
 0x32a   : > { %1194 = vmax.xlane.f32.xlu1 %v2386_v54 }
 0x32b   : > { %v1172_v55 = vpop.f32.mrf.mxu0 }
 0x32c   : > { %1190 = vmax.xlane.f32.xlu0 %v1172_v55 }
 0x3af   : > { %v1193_v58 = vpop.xlane.xlu1 %1192 }
 0x3b0   : > { %v1198_v60 = vmax.f32 %v1186_v57, %v1193_v58 }
 0x3b1   : > { %v1189_v61 = vpop.xlane.xlu0 %1188 }
 0x3b2   : > { %v1202_v63 = vsub.f32 %v1186_v57, %v1198_v60  ;;  %1392 = vst.msk [vmem:[#allocation4 + $0x10] sm:$0xff] %vm1264_vm7, %v1198_v60  ;;  %v1196_v0 = vmax.f32 %v1184_v59, %v1189_v61  ;;  %1224 = vperm.xlu1 %2559, %v1198_v60  }
 0x3b3   : > { %v1195_v1 = vpop.xlane.xlu1 %1194 }
 0x3b4   : > { %v1200_v3 = vsub.f32 %v1184_v59, %v1196_v0  ;;  %1390 = vst.msk [vmem:[#allocation4] sm:$0xff] %vm1264_vm7, %v1196_v0  ;;  %v1199_v4 = vmax.f32 %v1187_v62, %v1195_v1  ;;  %1214 = vperm.xlu0 %2558, %v1196_v0   ;;  %v1208_v27 = vmul.f32 1.442695, %v1202_v63 }
 0x3b5   : > { %v1191_v5 = vpop.xlane.xlu0 %1190 }
 0x3b6   : > { %v1203_v6 = vsub.f32 %v1187_v62, %v1199_v4  ;;  %1393 = vst.msk [vmem:[#allocation4 + $0x18] sm:$0xff] %vm1264_vm7, %v1199_v4  ;;  %v1197_v7 = vmax.f32 %v1185_v2, %v1191_v5  ;;  %v1204_v25 = vmul.f32 1.442695, %v1200_v3 }
 0x3b8   : > { %v1201_v8 = vsub.f32 %v1185_v2, %v1197_v7  ;;  %1391 = vst.msk [vmem:[#allocation4 + $0x8] sm:$0xff] %vm1264_vm7, %v1197_v7  ;;  %1219 = vperm.xlu1 %2559, %v1197_v7   ;;  %v1210_v28 = vmul.f32 1.442695, %v1203_v6  ;;  %v1246_v7 = vld [vmem:[#allocation5 + $0x10] sm:$0xff] }
 0x3ba   : > { %v1206_v26 = vmul.f32 1.442695, %v1201_v8 }
 0x3bc   : > { %1229 = vperm.xlu1 %2559, %v1199_v4  }
 0x42d   : > { %v1225_v9 = vpop.permute.xlu1 %1224 }
 0x42e   : > { %v1234_v13 = vsub.f32 %v2385_v52, %v1225_v9 }
 0x42f   : > { %v1215_v10 = vpop.permute.xlu0 %1214 }
 0x430   : > { %v1232_v11 = vsub.f32 %v1169_v53, %v1215_v10  ;;  %v1240_v17 = vmul.f32 1.442695, %v1234_v13 }
 0x432   : > { %v1236_v12 = vmul.f32 1.442695, %v1232_v11  ;;  %v1342_v11 = vlaneseq }
 0x433   : > { %v1220_v14 = vpop.permute.xlu1 %1219 }
 0x434   : > { %2562 = vpow2.f32 %v1236_v12  ;;  %v1233_v15 = vsub.f32 %v1172_v55, %v1220_v14  ;;  %v3059_v12 = vshrl.u32 %v1342_v11, 7 }
 0x436   : > { %v1238_v16 = vmul.f32 1.442695, %v1233_v15  ;;  %v1344_v13 = vsub.s32 0, %v3059_v12 }
 0x437   : > { %v1230_v18 = vpop.permute.xlu1 %1229 }
 0x438   : > { %2564 = vpow2.f32 %v1238_v16  ;;  %v1235_v19 = vsub.f32 %v2386_v54, %v1230_v18  ;;  %v1309_v16 = vld [vmem:[#allocation6] sm:$0xff] }
 0x439   : > { %2566 = vpow2.f32 %v1240_v17 }
 0x43a   : > { %v1242_v20 = vmul.f32 1.442695, %v1235_v19 }
 0x43c   : > { %2568 = vpow2.f32 %v1242_v20 }
 0x43d   : > { %2570 = vpow2.f32 %v1204_v25 }
 0x43e   : > { %2572 = vpow2.f32 %v1206_v26 }
 0x43f   : > { %2574 = vpow2.f32 %v1208_v27 }
 0x440   : > { %2576 = vpow2.f32 %v1210_v28 }
 0x441   : > { %v2563_v21 = vpop.eup %2562 }
 0x442   : > { %1252 = vadd.xlane.f32.xlu0 %v2563_v21  ;;  %1269 = vxpose.xlu1.b32.start [1/4] (short) %v2563_v21, 128 }
 0x445   : > { %v2565_v22 = vpop.eup %2564 }
 0x446   : > { %1254 = vadd.xlane.f32.xlu0 %v2565_v22  ;;  %1270 = vxpose.xlu1.b32.cont [2/4] (short) %v2565_v22, 128  ;;  %v2567_v23 = vpop.eup %2566 }
 0x449   : > { %v2569_v24 = vpop.eup %2568 }
 0x44a   : > { %1258 = vadd.xlane.f32.xlu0 %v2569_v24  ;;  %1271 = vxpose.xlu1.b32.cont [3/4] (short) %v2567_v23, 128  ;;  %v2571_v29 = vpop.eup %2570 }
 0x44b   : > { %v2573_v30 = vpop.eup %2572  ;;  %v1248_v40 = vmul.f32 %v2571_v29, %v1244_v38 }
 0x44c   : > { %v3049_v32 = vpop.eup %2574  ;;  %v1249_v46 = vmul.f32 %v2573_v30, %v1245_v43 }
 0x44d   : > { %v2577_v33 = vpop.eup %2576  ;;  %v1250_v8 = vmul.f32 %v3049_v32, %v1246_v7 }
 0x44e   : > { %1272 = vxpose.xlu1.b32.end [4/4] (short) %v2569_v24, 128  ;;  %v1251_v52 = vmul.f32 %v2577_v33, %v1247_v49 }
 0x477   : > { %1310 = vxpose.xlu0.b32.start [1/4] (short) (narrow) %v2571_v29, 8 }
 0x47b   : > { %1311 = vxpose.xlu0.b32.cont [2/4] (short) (narrow) %v2573_v30, 8 }
 0x47f   : > { %1312 = vxpose.xlu0.b32.cont [3/4] (short) (narrow) %v3049_v32, 8 }
 0x483   : > { %1313 = vxpose.xlu0.b32.end [4/4] (short) (narrow) %v2577_v33, 8 }
 0x4a5   : > { %1256 = vadd.xlane.f32.xlu1 %v2567_v23 }
 0x4be   : > { %v1285_v34 = vpop.trf.xlu1 }
 0x4c2   : > { %v1286_v35 = vpop.trf.xlu1 }
 0x4c3   : > { %v1301_v36 = vpack.c.bf16 %v1286_v35, %v1285_v34 }
 0x4c6   : > { %v1287_v37 = vpop.trf.xlu1 }
 0x4ca   : > { %v1288_v39 = vpop.trf.xlu1 }
 0x4cb   : > { %v1302_v41 = vpack.c.bf16 %v1288_v39, %v1287_v37  ;;  %v1253_v42 = vpop.xlane.xlu0 %1252 }
 0x4cc   : > { %v1260_v44 = vadd.f32 %v1253_v42, %v1248_v40 }
 0x4ce   : > { %1265 = vst.msk [vmem:[#allocation5] sm:$0xff] %vm1264_vm7, %v1260_v44  ;;  %v1289_v45 = vpop.trf.xlu1 }
 0x4cf   : > { %v1255_v47 = vpop.xlane.xlu0 %1254 }
 0x4d0   : > { %v1261_v50 = vadd.f32 %v1255_v47, %v1249_v46 }
 0x4d2   : > { %1266 = vst.msk [vmem:[#allocation5 + $0x8] sm:$0xff] %vm1264_vm7, %v1261_v50  ;;  %v1290_v51 = vpop.trf.xlu1 }
 0x4d3   : > { %v1259_v53 = vpop.xlane.xlu0 %1258  ;;  %v1303_v6 = vpack.c.bf16 %v1290_v51, %v1289_v45 }
 0x4d4   : > { %v1263_v54 = vadd.f32 %v1259_v53, %v1251_v52 }
 0x4d6   : > { %1268 = vst.msk [vmem:[#allocation5 + $0x18] sm:$0xff] %vm1264_vm7, %v1263_v54  ;;  %v1291_v55 = vpop.trf.xlu1 }
 0x4da   : > { %v1292_v56 = vpop.trf.xlu1 }
 0x4db   : > { %v1304_v5 = vpack.c.bf16 %v1292_v56, %v1291_v55 }
 0x4de   : > { %v1293_v57 = vpop.trf.xlu1 }
 0x4e2   : > { %v1294_v58 = vpop.trf.xlu1 }
 0x4e3   : > { %v1305_v4 = vpack.c.bf16 %v1294_v58, %v1293_v57 }
 0x4e6   : > { %v1295_v59 = vpop.trf.xlu1 }
 0x4ea   : > { %v1296_v60 = vpop.trf.xlu1 }
 0x4eb   : > { %v1306_v3 = vpack.c.bf16 %v1296_v60, %v1295_v59 }
 0x4ee   : > { %v1297_v61 = vpop.trf.xlu1 }
 0x4f2   : > { %v1298_v62 = vpop.trf.xlu1 }
 0x4f3   : > { %v1307_v2 = vpack.c.bf16 %v1298_v62, %v1297_v61  ;;  %v1326_v14 = vpop.trf.xlu0 }
 0x4f4   : > { %v1345_v15 = vrot.slane %v1326_v14, %v1344_v13 }
 0x4f6   : > { %v1299_v63 = vpop.trf.xlu1  ;;  %v1346_v17 = vmul.f32 %v1345_v15, %v1309_v16 }
 0x4fa   : > { %v1300_v0 = vpop.trf.xlu1 }
 0x4fb   : > { %v1308_v1 = vpack.c.bf16 %v1300_v0, %v1299_v63 }
 0x4fd   : > { %2388 = vmatpush3.bf16.msra.mxu1 %v1308_v1 }
 0x4fe   : > { %2389 = vmatprep.subr.bf16.mxu1 %v2724_v31 }
 0x501   : > { %2390 = vmatpush3.bf16.msra.mxu1 %v1307_v2 }
 0x502   : > { %2391 = vmatprep.subr.bf16.mxu1 %v2724_v31 }
 0x505   : > { %2392 = vmatpush3.bf16.msra.mxu1 %v1306_v3 }
 0x506   : > { %2393 = vmatprep.subr.bf16.mxu1 %v2724_v31 }
 0x509   : > { %2394 = vmatpush3.bf16.msra.mxu1 %v1305_v4 }
 0x50a   : > { %2395 = vmatprep.subr.bf16.mxu1 %v2724_v31 }
 0x50d   : > { %2396 = vmatpush3.bf16.msra.mxu1 %v1304_v5 }
 0x50e   : > { %2397 = vmatprep.subr.bf16.mxu1 %v2724_v31 }
 0x511   : > { %2398 = vmatpush3.bf16.msra.mxu1 %v1303_v6 }
 0x512   : > { %2399 = vmatprep.subr.bf16.mxu1 %v2724_v31 }
 0x515   : > { %2400 = vmatpush3.bf16.msra.mxu1 %v1302_v41 }
 0x516   : > { %2401 = vmatprep.subr.bf16.mxu1 %v2724_v31 }
 0x519   : > { %2402 = vmatpush3.bf16.msra.mxu1 %v1301_v36 }
 0x51c   : > { %2404 = vmatmul.mubr.bf16.vlgmr.msra.gmra.mxu1 %v3037_v48 }
 0x52e   : > { %v1257_v9 = vpop.xlane.xlu1 %1256 }
 0x52f   : > { %v1262_v10 = vadd.f32 %v1257_v9, %v1250_v8 }
 0x531   : > { %1267 = vst.msk [vmem:[#allocation5 + $0x10] sm:$0xff] %vm1264_vm7, %v1262_v10 }
 0x5dc   : > { %v1381_v48 = vpop.f32.mrf.mxu1 }
 0x5dd   : > { %v1387_v18 = vadd.f32 %v1381_v48, %v1346_v17 }
 0x5de   : > { %v2405_v19 = vpop.f32.mrf.mxu1  ;;  %1397 = sbr.rel (%p2271_p9) target bundleno = 3259 (0xcbb), region = 100 }
 0x5df   : > { %1389 = vst.msk [vmem:[#allocation6] sm:$0xff] %vm1388_vm9, %v1387_v18 }
 0x5e0   : > { %v1384_v20 = vpop.f32.mrf.mxu1 }
 0x5e2   : > { %v2406_v21 = vpop.f32.mrf.mxu1 }
 0x5e3   : > { %v1398_v22 = vld [vmem:[#allocation5] sm:$0xff]  ;;  %v1399_v23 = vld [vmem:[#allocation5 + $0x8] sm:$0xff]  ;;  %v2726_v24 = vmov 0   ;;  %v1400_v25 = vld [vmem:[#allocation5 + $0x10] sm:$0xff]  ;;  %v2727_v32 = vmov 0.0   ;;  %vm2728_vm10 = vmmov 0  }
 0x5e4   : > { %2578 = vset.pattern.permute.xlu0 %v2726_v24  ;;  %2594 = vrcp.f32 %v1398_v22  ;;  %2579 = vset.pattern.permute.xlu1 %v2726_v24  ;;  %v1401_v26 = vld [vmem:[#allocation5 + $0x18] sm:$0xff]  ;;  %v1470_v33 = vld [vmem:[%s2945_s19] sm:$0xf]  ;;  %v2278_v35 = vld [vmem:[%s2945_s19 + $0xc] sm:$0xf] }
 0x5e5   : > { %2596 = vrcp.f32 %v1399_v23  ;;  %2407 = vmatprep.subr.bf16.mxu0 %v2727_v32  ;;  %2425 = vmatprep.subr.bf16.mxu1 %v2727_v32  ;;  %v1475_v34 = vsel %vm1131_vm5, %v1470_v33, 0  ;;  %v1632_v36 = vsel %vm1131_vm5, %v2278_v35, 0  ;;  %v2274_v42 = vld [vmem:[%s2945_s19 + $0x4] sm:$0xf]  ;;  %v2276_v52 = vld [vmem:[%s2945_s19 + $0x8] sm:$0xf] }
 0x5e6   : > { %2598 = vrcp.f32 %v1400_v25  ;;  %v1410_v31 = vld [vmem:[#allocation6] sm:$0xff]  ;;  %2408 = vmatpush3.bf16.msra.mxu0 %v1475_v34  ;;  %2409 = vmatprep.mubr.msk.bf16.mxu0 %vm2728_vm10, %v2727_v32  ;;  %v1532_v46 = vsel %vm1131_vm5, %v2274_v42, 0  ;;  %v1581_v56 = vsel %vm1131_vm5, %v2276_v52, 0  ;;  %v2273_v63 = vld [vmem:[%s3318_s1] ss:$0 sm:$0xff] }
 0x5e7   : > { %2600 = vrcp.f32 %v1401_v26  ;;  %2413 = vmatprep.subr.bf16.mxu0 %v2727_v32  ;;  %2427 = vmatprep.mubr.msk.bf16.mxu1 %vm2728_vm10, %v2727_v32  ;;  %v1675_v14 = vld [vmem:[#allocation2] sm:$0xff] }
 0x5e8   : > { %2426 = vmatpush3.bf16.msra.mxu1 %v1632_v36  ;;  %v2585_v42 = vld [vmem:[%s2971_s24 + $0x4] ss:$8 sps:$4 sm:$0xff]  }
 0x5e9   : > { %2431 = vmatprep.subr.bf16.mxu1 %v2727_v32 }
 0x5f1   : > { %v2595_v27 = vpop.eup %2594 }
 0x5f2   : > { %v2597_v28 = vpop.eup %2596  ;;  %1445 = vperm.xlu0 %2578, %v2595_v27  }
 0x5f3   : > { %v2599_v29 = vpop.eup %2598 }
 0x5f4   : > { %1455 = vperm.xlu1 %2579, %v2599_v29   ;;  %v2601_v30 = vpop.eup %2600 }
 0x5f6   : > { %1450 = vperm.xlu0 %2578, %v2597_v28   ;;  %v2280_v28 = vld [vmem:[%s3319_s23] ss:$0 sm:$0xff] }
 0x5f8   : > { %1460 = vperm.xlu1 %2579, %v2601_v30   ;;  %v2281_v30 = vld [vmem:[%s3320_s2] ss:$0 sm:$0xff] }
 0x614   : > { %1411 = vxpose.xlu0.b32.start.end [1/1] (short) (narrow) %v1410_v31, 32 }
 0x66d   : > { %v1446_v37 = vpop.permute.xlu0 %1445 }
 0x66f   : > { %v1456_v41 = vpop.permute.xlu1 %1455 }
 0x671   : > { %v1451_v38 = vpop.permute.xlu0 %1450 }
 0x673   : > { %v1461_v49 = vpop.permute.xlu1 %1460 }
 0x690   : > { %v1427_v39 = vpop.trf.xlu0 }
 0x691   : > { %v1463_v43 = vmul.f32 %v1446_v37, %v1427_v39 }
 0x694   : > { %v1428_v40 = vpop.trf.xlu0 }
 0x695   : > { %v1464_v44 = vmul.f32 %v1451_v38, %v1428_v40  ;;  %v2580_v40 = vld [vmem:[%s2971_s24 + $0x10] ss:$8 sps:$4 sm:$0xff]  }
 0x697   : > { %v1467_v45 = vpack.c.bf16 %v1464_v44, %v1463_v43  ;;  %v2583_v43 = vld [vmem:[%s2971_s24] ss:$8 sps:$4 sm:$0xff]  }
 0x698   : > { %v1429_v47 = vpop.trf.xlu0 }
 0x699   : > { %2410 = vmatmul.mubr.msk.bf16.vlgmr.msra.gmra.mxu0 %vm1124_vm6, %v1467_v45  ;;  %v1465_v50 = vmul.f32 %v1456_v41, %v1429_v47  ;;  %v1527_v54 = vrot.slane %v1467_v45, 4  ;;  %v2582_v41 = vld [vmem:[%s2971_s24 + $0x14] ss:$8 sps:$4 sm:$0xff]   ;;  %s3322_s24 = scalar_lea.vmem %s3242_s10, %s2925_s22 }
 0x69a   : > { %2414 = vmatpush3.bf16.msra.mxu0 %v1532_v46  ;;  %2415 = vmatprep.mubr.msk.bf16.mxu0 %vm2728_vm10, %v2727_v32 }
 0x69b   : > { %2419 = vmatprep.subr.bf16.mxu0 %v2727_v32 }
 0x69c   : > { %v1430_v51 = vpop.trf.xlu0 }
 0x69d   : > { %v1466_v53 = vmul.f32 %v1461_v49, %v1430_v51  ;;  %v2282_v49 = vld [vmem:[%s3321_s29] ss:$0 sm:$0xff] }
 0x69e   : > { %v2283_v51 = vld [vmem:[%s3322_s24] ss:$0 sm:$0xff] }
 0x69f   : > { %v1468_v55 = vpack.c.bf16 %v1466_v53, %v1465_v50 }
 0x6a1   : > { %2416 = vmatmul.mubr.msk.bf16.vlgmr.msra.gmra.mxu0 %vm1124_vm6, %v1527_v54  ;;  %v1627_v57 = vrot.slane %v1468_v55, 4 }
 0x6a2   : > { %2420 = vmatpush3.bf16.msra.mxu0 %v1581_v56  ;;  %2421 = vmatprep.mubr.msk.bf16.mxu0 %vm2728_vm10, %v2727_v32  ;;  %v2587_v56 = vld [vmem:[%s2982_s4 + $0x30] sm:$0xff]  }
 0x6a3   : > { %2428 = vmatmul.mubr.msk.bf16.vlgmr.msra.gmra.mxu1 %vm1124_vm6, %v1627_v57  ;;  %1788 = vmatprep.subr.bf16.mxu0 %v2582_v41  ;;  %v2588_v57 = vld [vmem:[%s2982_s4 + $0x28] sm:$0xff]  }
 0x6a4   : > { %2447 = vmatprep.mubr.msk.bf16.mxu1 %vm2728_vm10, %v2727_v32 }
 0x6a9   : > { %2422 = vmatmul.mubr.msk.bf16.vlgmr.msra.gmra.mxu0 %vm1124_vm6, %v1468_v55  ;;  %v2586_v55 = vld [vmem:[%s2982_s4 + $0x38] sm:$0xff]  }
 0x6aa   : > { %1808 = vmatprep.mubr.bf16.mxu0 %v2726_v24  ;;  %1789 = vmatpush1.bf16.msra.mxu0 %v2580_v40 }
 0x6ab   : > { %1790 = vmatprep.subr.bf16.mxu0 %v2585_v42  ;;  %2432 = vmatpush3.bf16.msra.mxu1 %v2586_v55 }
 0x6ac   : > { %2433 = vmatprep.subr.bf16.mxu1 %v2727_v32 }
 0x6ae   : > { %1791 = vmatpush1.bf16.msra.mxu0 %v2583_v43 }
 0x6af   : > { %2434 = vmatpush3.bf16.msra.mxu1 %v2587_v56 }
 0x6b0   : > { %2435 = vmatprep.subr.bf16.mxu1 %v2727_v32 }
 0x6b3   : > { %2436 = vmatpush3.bf16.msra.mxu1 %v2588_v57 }
 0x6b4   : > { %2437 = vmatprep.subr.bf16.mxu1 %v2727_v32 }
 0x759   : > { %v1511_v58 = vpop.f32.mrf.mxu0 }
 0x75a   : > { %v1523_v4 = vadd.f32 %v2273_v63, %v1511_v58  ;;  %v2589_v58 = vld [vmem:[%s2982_s4 + $0x20] sm:$0xff]   ;;  %v1749_v63 = vsub.s32 1, %v3059_v12 }
 0x75b   : > { %v2411_v59 = vpop.f32.mrf.mxu0  ;;  %2438 = vmatpush3.bf16.msra.mxu1 %v2589_v58 }
 0x75c   : > { %2439 = vmatprep.subr.bf16.mxu1 %v2727_v32  ;;  %v2590_v59 = vld [vmem:[%s2982_s4 + $0x18] sm:$0xff]  }
 0x75d   : > { %v1514_v60 = vpop.f32.mrf.mxu0 }
 0x75e   : > { %v2591_v60 = vld [vmem:[%s2982_s4 + $0x10] sm:$0xff]  }
 0x75f   : > { %v2412_v61 = vpop.f32.mrf.mxu0  ;;  %2440 = vmatpush3.bf16.msra.mxu1 %v2590_v59 }
 0x760   : > { %2441 = vmatprep.subr.bf16.mxu1 %v2727_v32  ;;  %v2592_v61 = vld [vmem:[%s2982_s4 + $0x8] sm:$0xff]  }
 0x761   : > { %v1568_v62 = vpop.f32.mrf.mxu0 }
 0x762   : > { %v1574_v7 = vadd.f32 %v1568_v62, %v1523_v4  ;;  %v2593_v62 = vld [vmem:[%s2982_s4] sm:$0xff]  }
 0x763   : > { %v2417_v0 = vpop.f32.mrf.mxu0  ;;  %v1668_v1 = vpop.f32.mrf.mxu1  ;;  %2442 = vmatpush3.bf16.msra.mxu1 %v2591_v60 }
 0x764   : > { %2443 = vmatprep.subr.bf16.mxu1 %v2727_v32  ;;  %v1741_v0 = vld [vmem:[%s2977_s17] sm:$0x3] }
 0x765   : > { %v1571_v2 = vpop.f32.mrf.mxu0  ;;  %v2429_v3 = vpop.f32.mrf.mxu1 }
 0x767   : > { %v2418_v5 = vpop.f32.mrf.mxu0  ;;  %v1671_v6 = vpop.f32.mrf.mxu1  ;;  %2444 = vmatpush3.bf16.msra.mxu1 %v2592_v61 }
 0x768   : > { %2445 = vmatprep.subr.bf16.mxu1 %v2727_v32  ;;  %v1746_v32 = vrot.slane %v1741_v0, %v1344_v13 }
 0x769   : > { %v1617_v8 = vpop.f32.mrf.mxu0  ;;  %v2430_v9 = vpop.f32.mrf.mxu1 }
 0x76a   : > { %v1623_v10 = vadd.f32 %v1617_v8, %v1574_v7 }
 0x76b   : > { %v2423_v11 = vpop.f32.mrf.mxu0  ;;  %2446 = vmatpush3.bf16.msra.mxu1 %v2593_v62 }
 0x76c   : > { %v1674_v15 = vadd.f32 %v1668_v1, %v1623_v10  ;;  %v1750_v1 = vrot.slane %v1741_v0, %v1749_v63 }
 0x76d   : > { %v1620_v16 = vpop.f32.mrf.mxu0 }
 0x76e   : > { %v1676_v17 = vadd.f32 %v1675_v14, %v1674_v15 }
 0x76f   : > { %v2424_v48 = vpop.f32.mrf.mxu0 }
 0x770   : > { %v1679_v18 = vsel %vm1388_vm9, %v1676_v17, 0.0 }
 0x771   : > { %1680 = vadd.xlane.f32.xlu1 %v1679_v18 }
 0x7fa   : > { %v1681_v19 = vpop.xlane.xlu1 %1680 }
 0x7fb   : > { %v1683_v20 = vmul.f32 0.03125, %v1681_v19 }
 0x7fd   : > { %v1684_v21 = vsub.f32 %v1676_v17, %v1683_v20  ;;  %v2289_v20 = vld [vmem:[%s807_s28] ss:$0 sm:$0xff] }
 0x7ff   : > { %v1685_v22 = vmul.f32 %v1684_v21, %v1684_v21 }
 0x801   : > { %v1686_v23 = vsel %vm1388_vm9, %v1685_v22, 0.0 }
 0x802   : > { %1687 = vadd.xlane.f32.xlu0 %v1686_v23 }
 0x88b   : > { %v1688_v24 = vpop.xlane.xlu0 %1687 }
 0x88c   : > { %v1689_v25 = vmul.f32 0.03125, %v1688_v24 }
 0x88e   : > { %v1690_v26 = vadd.f32 1e-05, %v1689_v25 }
 0x890   : > { %2602 = vrsqrt.f32 %v1690_v26 }
 0x89d   : > { %v2603_v27 = vpop.eup %2602 }
 0x89e   : > { %v1692_v29 = vmul.f32 %v2603_v27, %v1684_v21 }
 0x8a0   : > { %v1699_v31 = vmul.f32 %v2280_v28, %v1692_v29 }
 0x8a2   : > { %v3113_v33 = vadd.f32 %v2281_v30, %v1699_v31 }
 0x8a4   : > { %v1709_v34 = vsel %vm1388_vm9, %v3113_v33, 0.0 }
 0x8a5   : > { %1710 = vadd.xlane.f32.xlu1 %v1709_v34 }
 0x92e   : > { %v1711_v35 = vpop.xlane.xlu1 %1710 }
 0x92f   : > { %v1712_v36 = vmul.f32 0.03125, %v1711_v35 }
 0x931   : > { %v1713_v37 = vsub.f32 %v3113_v33, %v1712_v36 }
 0x933   : > { %v1714_v38 = vmul.f32 %v1713_v37, %v1713_v37 }
 0x935   : > { %v1715_v39 = vsel %vm1388_vm9, %v1714_v38, 0.0  ;;  %v2299_v38 = vld [vmem:[%s813_s11] ss:$0 sm:$0xff] }
 0x936   : > { %1716 = vadd.xlane.f32.xlu1 %v1715_v39 }
 0x9bf   : > { %v1717_v44 = vpop.xlane.xlu1 %1716 }
 0x9c0   : > { %v1718_v45 = vmul.f32 0.03125, %v1717_v44 }
 0x9c2   : > { %v1719_v46 = vadd.f32 1e-05, %v1718_v45 }
 0x9c4   : > { %2604 = vrsqrt.f32 %v1719_v46 }
 0x9d1   : > { %v2605_v47 = vpop.eup %2604 }
 0x9d2   : > { %v1721_v50 = vmul.f32 %v2605_v47, %v1713_v37 }
 0x9d4   : > { %v1728_v52 = vmul.f32 %v2282_v49, %v1721_v50 }
 0x9d6   : > { %v1735_v53 = vadd.f32 %v2283_v51, %v1728_v52 }
 0x9d8   : > { %v1736_v54 = vpack.c.bf16 %v1735_v53, %v1735_v53 }
 0x9da   : > { %2288 = vmatmul.mubr.msk.bf16.vlgmr.msra.gmra.mxu0 %vm1388_vm9, %v1736_v54 }
 0xa9a   : > { %v1810_v2 = vpop.f32.mrf.mxu0 }
 0xa9b   : > { %v1811_v17 = vadd.f32 %v1810_v2, %v1746_v32 }
 0xa9c   : > { %v1812_v3 = vpop.f32.mrf.mxu0 }
 0xa9d   : > { %v1813_v4 = vadd.f32 %v1812_v3, %v1750_v1 }
 0xa9e   : > { %v1814_v5 = vpop.f32.mrf.mxu0 }
 0xa9f   : > { %v1817_v6 = vmul.f32 %v1813_v4, %v1813_v4 }
 0xaa0   : > { %v1815_v7 = vpop.f32.mrf.mxu0 }
 0xaa1   : > { %v1818_v8 = vmul.f32 %v1817_v6, %v1813_v4 }
 0xaa3   : > { %v1819_v9 = vmul.f32 0.044715, %v1818_v8 }
 0xaa5   : > { %v1820_v10 = vadd.f32 %v1819_v9, %v1813_v4 }
 0xaa7   : > { %v1821_v11 = vmul.f32 0.7978846, %v1820_v10 }
 0xaa9   : > { %2606 = vtanh.f32 %v1821_v11 }
 0xab6   : > { %v2607_v14 = vpop.eup %2606 }
 0xab7   : > { %v1823_v15 = vadd.f32 1.0, %v2607_v14 }
 0xab9   : > { %v1824_v16 = vmul.f32 0.5, %v1823_v15 }
 0xabb   : > { %v1825_v48 = vmul.f32 %v1824_v16, %v1813_v4 }
 0xabd   : > { %v1826_v18 = vmul.f32 %v1825_v48, %v1811_v17 }
 0xabf   : > { %v1827_v19 = vpack.c.bf16 %v1826_v18, %v1826_v18 }
 0xac1   : > { %2448 = vmatmul.mubr.bf16.vlgmr.msra.gmra.mxu1 %v1827_v19 }
 0xb81   : > { %v1933_v21 = vpop.f32.mrf.mxu1 }
 0xb82   : > { %v1934_v22 = vadd.f32 %v2289_v20, %v1933_v21 }
 0xb83   : > { %v2449_v23 = vpop.f32.mrf.mxu1 }
 0xb84   : > { %v1939_v24 = vadd.f32 %v1934_v22, %v3113_v33  ;;  %v2298_v33 = vld [vmem:[%s810_s5] ss:$0 sm:$0xff] }
 0xb85   : > { %v1936_v12 = vpop.f32.mrf.mxu1 }
 0xb86   : > { %v1942_v13 = vsel %vm1388_vm9, %v1939_v24, 0.0 }
 0xb87   : > { %1943 = vadd.xlane.f32.xlu1 %v1942_v13  ;;  %v2450_v25 = vpop.f32.mrf.mxu1 }
 0xc10   : > { %v1944_v26 = vpop.xlane.xlu1 %1943 }
 0xc11   : > { %v1945_v27 = vmul.f32 0.03125, %v1944_v26 }
 0xc13   : > { %v1946_v28 = vsub.f32 %v1939_v24, %v1945_v27 }
 0xc15   : > { %v1947_v29 = vmul.f32 %v1946_v28, %v1946_v28 }
 0xc17   : > { %v1948_v30 = vsel %vm1388_vm9, %v1947_v29, 0.0 }
 0xc18   : > { %1949 = vadd.xlane.f32.xlu1 %v1948_v30 }
 0xca1   : > { %v1950_v31 = vpop.xlane.xlu1 %1949 }
 0xca2   : > { %v1951_v34 = vmul.f32 0.03125, %v1950_v31 }
 0xca4   : > { %v1952_v35 = vadd.f32 1e-05, %v1951_v34 }
 0xca6   : > { %2608 = vrsqrt.f32 %v1952_v35 }
 0xcb3   : > { %v2609_v36 = vpop.eup %2608 }
 0xcb4   : > { %v1954_v37 = vmul.f32 %v2609_v36, %v1946_v28 }
 0xcb6   : > { %v1961_v39 = vmul.f32 %v2298_v33, %v1954_v37 }
 0xcb8   : > { %v1968_v40 = vadd.f32 %v2299_v38, %v1961_v39 }
 0xcba   : > { %1969 = vst.msk [vmem:[#allocation2] sm:$0xff] %vm1388_vm9, %v1968_v40 }
 0xcbb PF: > { %s3324_s23 = sld [smem:[#allocation14_spill]] }
 0xcc1   : > { %p1970_p10 = scmp.eq.s32.totalorder %s3324_s23, 1 }
 0xcc3   : > { %p1971_p11 = pnand %p1970_p10, %p1394_p7 }
 0xcc5   : > { %1974 = sbr.rel (%p1971_p11) target bundleno = 3276 (0xccc), region = 104 }
 0xcca   : > { %v1975_v41 = vld [vmem:[#allocation2] sm:$0xff] }
 0xccb   : > { %1976 = vst.msk [vmem:[%s751_s3] sm:$0xff] %vm1388_vm9, %v1975_v41 }
 0xccc PF: > { %s3326_s5 = sld [smem:[#allocation15_spill]]  ;;  %s1991_s19 = sshll.u32 %s751_s3, 4  ;;  %s1992_s19 = int_to_ptr.vmem [resolvable:$true] %s1991_s19 }
 0xccd   : > { %s3327_s11 = sld [smem:[#allocation11_spill]]  ;;  %s2610_s4 = scalar_lea.vmem %s1992_s19, 128 }
 0xcce   : > { %s3329_s0 = sld [smem:[#allocation37_spill]]  ;;  %p2611_p12 = scmp.ne.s32.totalorder %s1992_s19, %s2610_s4 }
 0xccf   : > { %s2729_s28 = smov [#allocation7]  }
 0xcd0   : > { %p2612_p13 = pnand %p2611_p12, %p2882_p6  ;;  %s2614_s27 = sshll.u32 %s2729_s28, 4  ;;  %s2615_s27 = int_to_ptr.vmem [resolvable:$false] %s2614_s27 }
 0xcd1   : > { %s2616_s1 = scalar_lea.vmem %s2615_s27, 256  ;;  %p2617_p1 = scmp.lt.s32.totalorder %s1992_s19, %s2615_s27 }
 0xcd2   : > { %s2301_s20 = sshll.u32 %s3326_s5, 7  ;;  %p2613_p0 = pneg %p2612_p13 }
 0xcd3   : > { %s3331_s24 = sand.u32 1, %s3327_s11   ;;  %p2618_p2 = scmp.lt.s32.totalorder %s2616_s1, %s2610_s4 }
 0xcd4   : > { %s3330_s21 = smov %s3329_s0  ;;  %s1989_s29 = scalar_lea.hbm %s3329_s0, %s2301_s20 }
 0xcd5   : > { %s1978_s17 = scalar_lea.sflag [#allocation8], %s3331_s24  ;;  %p2619_p3 = por %p2618_p2, %p2617_p1 }
 0xcd7   : > { %p2620_p4 = pnand %p2619_p3, %p2613_p0 }
 0xcd9   : > { %2623 = shalt.err (!%p2620_p4)
}
 0xcda   : > { %s2624_s26 = scalar_lea.hbm %s1989_s29, 128  ;;  %s2628_s25 = scalar_lea.hbm %s3330_s21, 256 }
 0xcdb   : > { %p2625_p5 = scmp.ne.s32.totalorder %s1989_s29, %s2624_s26  ;;  %p2629_p10 = scmp.lt.s32.totalorder %s1989_s29, %s3330_s21 }
 0xcdc   : > { %p2630_p11 = scmp.lt.s32.totalorder %s2628_s25, %s2624_s26 }
 0xcdd   : > { %p2626_p7 = pnand %p2625_p5, %p2882_p6 }
 0xcde   : > { %p2631_p12 = por %p2630_p11, %p2629_p10 }
 0xcdf   : > { %p2627_p9 = pneg %p2626_p7 }
 0xce1   : > { %p2632_p13 = pnand %p2631_p12, %p2627_p9 }
 0xce3   : > { %2635 = shalt.err (!%p2632_p13)
}
 0xce4   : > { %2452 = dma.vmem_to_hbm [thread:$0]  (%p2882_p6), %s1992_s19, 128, %s1989_s29, %s1978_s17  }
 0xce5 PF: > { %s3332_s5 = sld [smem:[#allocation19_spill]] }
 0xce6   : > { %s3333_s11 = sld [smem:[#allocation10_spill]] }
 0xceb   : > { %p2458_p0 = scmp.ge.s32.totalorder %s3332_s5, 2 }
 0xcec   : > { %s2003_s2 = sand.u32 1, %s3333_s11  }
 0xced   : > { %p2455_p1 = pnand %p2458_p0, %p2890_p8  ;;  %s2004_s18 = scalar_lea.sflag [#allocation8], %s2003_s2 }
 0xcef   : > { %p2456_p2 = pneg %p2455_p1 }
 0xcf1   : > { %2677 = dma.done.wait (%p2456_p2), %s2004_s18, 128  }
 0xcf2   : > { %2679 = vsyncadd (%p2456_p2), %s2004_s18, 4294967168  ;;  %s30_s19 = sadd.s32 1, %s3332_s5   ;;  %s3335_s24 = sld [smem:[#allocation11_spill]] }
 0xcf3   : > { %p27_p3 = scmp.ge.s32.totalorder %s30_s19, 10   ;;  %s3336_s25 = sld [smem:[#allocation12_spill]] }
 0xcf4   : > { %s3337_s26 = sld [smem:[#allocation25_spill]] }
 0xcf5   : > { %s3338_s27 = sld [smem:[#allocation16_spill]] }
 0xcf6   : > { %s3339_s28 = sld [smem:[#allocation17_spill]]  ;;  %29 = sbr.rel (!%p27_p3) target bundleno = 16 (0x10), region = 190 }
 0xcf7   : > { %s3340_s29 = sld [smem:[#allocation18_spill]] }
 0xcf8   : > { %s3341_s0 = sld [smem:[#allocation20_spill]] }
 0xcf9   : > { %s3342_s30 = sld [smem:[#allocation22_spill]] }
 0xcfa   : > { %s3343_s18 = sld [smem:[#allocation24_spill]] }
 0xcfb   :  { %2009 = vsyncpa [#allocation8], 1 }
 0xcfc   :  { %2011 = vsyncpa [#allocation8 + $0x1], 1 }

</bundles_post_ra>
